<compile_context>
chip_gen: v7x
topology: tpu7x:2x2x1
jax: 0.10.0
libtpu: 0.0.40
codegen_flags: <defaults>
</compile_context>

<pallas_src>
import jax
import jax.numpy as jnp
from jax.experimental import pallas as pl
from jax.experimental.pallas import tpu as pltpu

IN_PLANES = 256      # stands in for 1280/1536/2560 of efficientnet-b0/b3/b7
NUM_CLASSES = 16
BN_EPS = 1e-5


def _pick_tile(c, cap):
    """Largest multiple-of-128 divisor of c that is <= cap (falls back to c)."""
    best = None
    t = 128
    while t <= min(cap, c):
        if c % t == 0:
            best = t
        t += 128
    return best if best is not None else c


# ----------------------------------------------------------------- GAP pass --

def _gap_kernel(x_ref, gap_ref):
    # x_ref: [B, tc, HW] bf16 block of the NCHW feature map (HW on lanes).
    x = x_ref[...].astype(jnp.float32)          # accumulate the mean in f32
    inv_hw = 1.0 / x.shape[-1]
    gap_ref[...] = (jnp.sum(x, axis=-1) * inv_hw).astype(gap_ref.dtype)


def _gap_pass(x_bchw, *, tc):
    """x_bchw: [B, C, HW] bf16 (native NCHW layout, no transpose). Returns gap [B, C] bf16."""
    B, C, HW = x_bchw.shape
    cost = pl.CostEstimate(flops=B * C * HW, transcendentals=0,
                           bytes_accessed=x_bchw.size * 2 + B * C * 2)
    return pl.pallas_call(
        _gap_kernel,
        out_shape=jax.ShapeDtypeStruct((B, C), jnp.bfloat16),
        grid_spec=pltpu.PrefetchScalarGridSpec(
            num_scalar_prefetch=0,
            grid=(C // tc,),
            in_specs=[pl.BlockSpec((B, tc, HW), lambda j: (0, j, 0))],
            out_specs=pl.BlockSpec((B, tc), lambda j: (0, j)),
        ),
        compiler_params=pltpu.CompilerParams(
            dimension_semantics=("parallel",),
            vmem_limit_bytes=32 * 1024 * 1024),
        cost_estimate=cost,
    )(x_bchw)


# ---------------------------------------------------------------- head pass --

def _head_kernel(gap_ref, wfc_ref, bfc_ref, gamma_ref, beta_ref, wcls_ref,
                 cls_ref, gfeat_ref, acc_sc):
    j = pl.program_id(0)
    tn = gfeat_ref.shape[1]
    col = pl.multiple_of(j * tn, 128)           # lane/sublane offset into resident params

    @pl.when(j == 0)
    def _():
        acc_sc[...] = jnp.zeros_like(acc_sc)    # padded classifier accumulator

    # self.fc_global_feat: this C_out tile of y = gap @ W + b (W stored [in, out], bf16).
    gfeat = jnp.dot(gap_ref[...], wfc_ref[...], preferred_element_type=jnp.float32)
    gfeat = gfeat + bfc_ref[:, pl.ds(col, tn)]
    gfeat_ref[...] = gfeat                      # global_feat (pre-BN) output tile

    # self.bottleneck = nn.BatchNorm1d (bnneck), training mode -> biased batch stats.
    # Per-channel over the batch and the full batch is inside this block, so per-tile
    # statistics are exact (keep this invariant if the grid is ever split per core).
    mu = jnp.mean(gfeat, axis=0, keepdims=True)
    var = jnp.mean((gfeat - mu) ** 2, axis=0, keepdims=True)
    feat = (gfeat - mu) * jax.lax.rsqrt(var + BN_EPS)
    feat = feat * gamma_ref[:, pl.ds(col, tn)] + beta_ref[:, pl.ds(col, tn)]

    # training path with global_feat_fc: feat = F.relu(feat)
    feat = jnp.maximum(feat, 0.0)

    # self.classifier (bias=False): partial contraction over this C_out tile,
    # accumulated in a 128-lane-padded f32 scratch (unmasked stores).
    acc_sc[...] += jnp.dot(feat.astype(jnp.bfloat16),
                           wcls_ref[pl.ds(col, tn), :],
                           preferred_element_type=jnp.float32)

    @pl.when(j == pl.num_programs(0) - 1)
    def _():
        cls_ref[...] = acc_sc[...]


def baseline_efficientnet_head(feat_map, w_fc, b_fc, bn_gamma, bn_beta, w_cls,
                               *, tn=None, tc=None):
    """feat_map: [B, C, H, W] output of base.extract_features (NCHW).

    Returns (cls_score [B, num_classes], global_feat [B, C]) -- training forward
    with neck='bnneck' and global_feat_fc=True.
    """
    B, C, H, W = feat_map.shape
    NC = w_cls.shape[1]
    HW = H * W
    NC_pad = ((NC + 127) // 128) * 128

    tn = _pick_tile(C, 1024) if tn is None else tn    # 640 for 1280/2560, 768 for 1536
    tc = _pick_tile(C, 512) if tc is None else tc
    assert C % tn == 0 and C % tc == 0, "tile sizes must divide C"

    # 1) GAP straight from the NCHW layout: reshape (free) + bf16, no transpose.
    x = feat_map.reshape(B, C, HW).astype(jnp.bfloat16)
    gap_bf = _gap_pass(x, tc=tc)                                   # [B, C] bf16, lane-dense

    # 2) Head operands: bf16 weights in HBM (halves the dominant w_fc DMA stream);
    #    classifier weight zero-padded to a full 128-lane width.
    w_fc_bf = w_fc.astype(jnp.bfloat16)                            # [C_in, C_out]
    w_cls_bf = jnp.zeros((C, NC_pad), jnp.bfloat16).at[:, :NC].set(
        w_cls.astype(jnp.bfloat16))
    b_fc2 = b_fc.reshape(1, C).astype(jnp.float32)
    gamma2 = bn_gamma.reshape(1, C).astype(jnp.float32)
    beta2 = bn_beta.reshape(1, C).astype(jnp.float32)

    flops = 2 * B * C * C + 2 * B * C * NC_pad
    bytes_accessed = (B * C * 2 + w_fc_bf.size * 2 + w_cls_bf.size * 2
                      + 3 * C * 4 + B * C * 4 + B * NC_pad * 4)
    cost = pl.CostEstimate(flops=flops, transcendentals=0, bytes_accessed=bytes_accessed)

    def _build(resident_kw):
        def rspec(shape):
            # Constant-index blocks: DMA'd once; single-buffer them to save VMEM.
            return pl.BlockSpec(shape, lambda j: (0, 0), **resident_kw)

        return pl.pallas_call(
            _head_kernel,
            out_shape=(
                jax.ShapeDtypeStruct((B, NC_pad), jnp.float32),    # padded cls_score
                jax.ShapeDtypeStruct((B, C), jnp.float32),         # global_feat (pre-BN)
            ),
            grid_spec=pltpu.PrefetchScalarGridSpec(
                num_scalar_prefetch=0,
                grid=(C // tn,),
                in_specs=[
                    rspec((B, C)),                                 # gap (resident)
                    pl.BlockSpec((C, tn), lambda j: (0, j)),       # w_fc tile (streamed)
                    rspec((1, C)),                                 # b_fc (resident)
                    rspec((1, C)),                                 # bn gamma (resident)
                    rspec((1, C)),                                 # bn beta (resident)
                    rspec((C, NC_pad)),                            # w_cls (resident)
                ],
                out_specs=[
                    pl.BlockSpec((B, NC_pad), lambda j: (0, 0)),   # written at last step
                    pl.BlockSpec((B, tn), lambda j: (0, j)),       # global_feat tile
                ],
                scratch_shapes=[pltpu.VMEM((B, NC_pad), jnp.float32)],
            ),
            compiler_params=pltpu.CompilerParams(
                dimension_semantics=("arbitrary",),                # classifier reduction axis
                vmem_limit_bytes=32 * 1024 * 1024),
            cost_estimate=cost,
        )

    args = (gap_bf, w_fc_bf, b_fc2, gamma2, beta2, w_cls_bf)
    try:
        cls_pad, gfeat = _build({"pipeline_mode": pl.Buffered(1)})(*args)
    except Exception:
        # Fallback if this jax build rejects single-buffered pipeline_mode.
        cls_pad, gfeat = _build({})(*args)

    return cls_pad[:, :NC], gfeat


if __name__ == "__main__":
    key = jax.random.PRNGKey(0)
    k1, k2, k3 = jax.random.split(key, 3)

    B, C, Hs, Ws = 2, IN_PLANES, 8, 8

    # TODO(synk): base = EfficientNet.from_pretrained(...) (base.extract_features) is an
    # external pretrained backbone with no in-script Pallas equivalent; the kernels
    # consume its output feature map directly.
    feat_map = jax.random.normal(k1, (B, C, Hs, Ws), jnp.float32)

    # fc_global_feat = nn.Linear(C, C): stored as [in, out]
    w_fc = jax.random.normal(k2, (C, C), jnp.float32) * (1.0 / jnp.sqrt(C))
    b_fc = jnp.zeros((C,), jnp.float32)

    # bnneck BatchNorm1d with weights_init_kaiming: weight=1, bias=0 (bias frozen)
    bn_gamma = jnp.ones((C,), jnp.float32)
    bn_beta = jnp.zeros((C,), jnp.float32)

    # classifier = nn.Linear(C, num_classes, bias=False), weights_init_classifier std=0.001
    w_cls = jax.random.normal(k3, (C, NUM_CLASSES), jnp.float32) * 0.001

    cls_score, global_feat = baseline_efficientnet_head(
        feat_map, w_fc, b_fc, bn_gamma, bn_beta, w_cls)
    jax.block_until_ready((cls_score, global_feat))

    # pure-JAX reference with the same bf16 streaming / matmul precision as the kernels
    x_bf = feat_map.astype(jnp.bfloat16).astype(jnp.float32)
    gap_r = jnp.mean(x_bf.reshape(B, C, -1), axis=-1).astype(jnp.bfloat16)
    gfeat_r = jnp.dot(gap_r, w_fc.astype(jnp.bfloat16),
                      preferred_element_type=jnp.float32) + b_fc
    mu = gfeat_r.mean(0, keepdims=True)
    var = ((gfeat_r - mu) ** 2).mean(0, keepdims=True)
    feat_r = (gfeat_r - mu) * jax.lax.rsqrt(var + BN_EPS) * bn_gamma + bn_beta
    feat_r = jnp.maximum(feat_r, 0.0)
    cls_r = jnp.dot(feat_r.astype(jnp.bfloat16), w_cls.astype(jnp.bfloat16),
                    preferred_element_type=jnp.float32)

    assert jnp.allclose(global_feat, gfeat_r, atol=1e-2, rtol=1e-2)
    assert jnp.allclose(cls_score, cls_r, atol=1e-2, rtol=1e-2)

    print("KERNEL_OK")
</pallas_src>

<mosaic_0001>
module attributes {stable_mosaic.version = 11 : i64} {
  func.func @_gap_kernel(%arg0: i32, %arg1: memref<2x256x64xbf16, #tpu.memory_space<vmem>>, %arg2: memref<2x256xbf16, #tpu.memory_space<vmem>>) attributes {dimension_semantics = [#tpu.dimension_semantics<parallel>], iteration_bounds = array<i64: 1>, scalar_prefetch = 0 : i64, scratch_operands = 0 : i64, tpu.core_type = #tpu.core_type<tc>, window_params = [{transform_indices = @transform_0, window_bounds = array<i64: 2, 256, 64>}, {transform_indices = @transform_1, window_bounds = array<i64: 2, 256>}]} {
    %c0 = arith.constant 0 : index
    %c0_0 = arith.constant 0 : index
    %c0_1 = arith.constant 0 : index
    %0 = vector.load %arg1[%c0, %c0_0, %c0_1] : memref<2x256x64xbf16, #tpu.memory_space<vmem>>, vector<2x256x64xbf16>
    %1 = arith.extf %0 : vector<2x256x64xbf16> to vector<2x256x64xf32>
    %cst = arith.constant dense<0.000000e+00> : vector<2x256xf32>
    %2 = vector.multi_reduction <add>, %1, %cst [2] : vector<2x256x64xf32> to vector<2x256xf32>
    %cst_2 = arith.constant 1.562500e-02 : f32
    %3 = vector.broadcast %cst_2 : f32 to vector<2x256xf32>
    %4 = arith.mulf %2, %3 : vector<2x256xf32>
    %5 = arith.truncf %4 : vector<2x256xf32> to vector<2x256xbf16>
    %c0_3 = arith.constant 0 : index
    %c0_4 = arith.constant 0 : index
    %6 = vector.load %arg2[%c0_3, %c0_4] : memref<2x256xbf16, #tpu.memory_space<vmem>>, vector<2x256xbf16>
    tpu.vector_store %arg2[%c0_3, %c0_4], %5 {strides = array<i32>} : memref<2x256xbf16, #tpu.memory_space<vmem>>, vector<2x256xbf16>,
    return
  }
  func.func @transform_0(%arg0: i32) -> (i32, i32, i32) {
    %c0_i32 = arith.constant 0 : i32
    %c0_i32_0 = arith.constant 0 : i32
    %c0_i32_1 = arith.constant 0 : i32
    return %c0_i32, %arg0, %c0_i32_0 : i32, i32, i32
  }
  func.func @transform_1(%arg0: i32) -> (i32, i32) {
    %c0_i32 = arith.constant 0 : i32
    %c0_i32_0 = arith.constant 0 : i32
    return %c0_i32, %arg0 : i32, i32
  }
}

</mosaic_0001>

<bundles_post_ra>
// kernel: tpu_custom_call.1
= control target key start
LH: loop header
LB: loop body
LE: loop exit
PB: predicated region body
PF: predicated region fallthrough
CT: control target
= control target key end

     0   :  { %vm137_vm0 = vcmask 523264   ;;  %s5077_s0 = inlined_call_operand.vmem [shape: bf16[2,256,64], index: 0, kind: input, shape index: {}]   ;;  %s5078_s1 = inlined_call_operand.hbm [shape: bf16[2,256], index: 1, kind: output, shape index: {}]  }
   0x1   :  { %v3785_v0 = vld [vmem:[%s5077_s0 + $0x8] sm:$0xff]   ;;  %v3658_v1 = vld [vmem:[%s5077_s0] sm:$0xff]   ;;  %v3786_v6 = vld [vmem:[%s5077_s0 + $0x10] sm:$0xff]  }
   0x2   :  { %v3663_v2 = vunpack.c.l.bf16 %v3785_v0  ;;  %v3659_v3 = vunpack.c.l.bf16 %v3658_v1  ;;  %v3664_v4 = vunpack.c.h.bf16 %v3785_v0  ;;  %v3660_v5 = vunpack.c.h.bf16 %v3658_v1  ;;  %v3787_v13 = vld [vmem:[%s5077_s0 + $0x18] sm:$0xff]   ;;  %v3788_v18 = vld [vmem:[%s5077_s0 + $0x20] sm:$0xff]  }
   0x3   :  { %v3668_v11 = vunpack.c.h.bf16 %v3786_v6  ;;  %v3667_v12 = vunpack.c.l.bf16 %v3786_v6  ;;  %v3672_v16 = vunpack.c.h.bf16 %v3787_v13  ;;  %v3671_v17 = vunpack.c.l.bf16 %v3787_v13 }
   0x4   :  { %v144_v7 = vsel %vm137_vm0, %v3663_v2, 0.0  ;;  %v138_v8 = vsel %vm137_vm0, %v3659_v3, 0.0  ;;  %v147_v9 = vsel %vm137_vm0, %v3664_v4, 0.0  ;;  %v141_v10 = vsel %vm137_vm0, %v3660_v5, 0.0 }
   0x5   :  { %145 = vadd.xlane.f32.xlu1 %v144_v7  ;;  %139 = vadd.xlane.f32.xlu0 %v138_v8  ;;  %v153_v14 = vsel %vm137_vm0, %v3668_v11, 0.0  ;;  %v150_v15 = vsel %vm137_vm0, %v3667_v12, 0.0  ;;  %v159_v19 = vsel %vm137_vm0, %v3672_v16, 0.0  ;;  %v156_v20 = vsel %vm137_vm0, %v3671_v17, 0.0 }
   0x6   :  { %v3676_v21 = vunpack.c.h.bf16 %v3788_v18  ;;  %v3675_v22 = vunpack.c.l.bf16 %v3788_v18 }
   0x9   :  { %148 = vadd.xlane.f32.xlu1 %v147_v9  ;;  %142 = vadd.xlane.f32.xlu0 %v141_v10 }
   0xd   :  { %154 = vadd.xlane.f32.xlu1 %v153_v14  ;;  %151 = vadd.xlane.f32.xlu0 %v150_v15 }
   0xe   :  { %6 = vsyncpa [#allocation3], 0  ;;  %v3789_v23 = vld [vmem:[%s5077_s0 + $0x28] sm:$0xff]   ;;  %v165_v24 = vsel %vm137_vm0, %v3676_v21, 0.0  ;;  %v162_v25 = vsel %vm137_vm0, %v3675_v22, 0.0  ;;  %v3790_v28 = vld [vmem:[%s5077_s0 + $0x30] sm:$0xff]  }
   0xf   :  { %v3680_v26 = vunpack.c.h.bf16 %v3789_v23  ;;  %v3679_v27 = vunpack.c.l.bf16 %v3789_v23  ;;  %v3684_v31 = vunpack.c.h.bf16 %v3790_v28  ;;  %v3683_v32 = vunpack.c.l.bf16 %v3790_v28  ;;  %v3791_v33 = vld [vmem:[%s5077_s0 + $0x38] sm:$0xff]   ;;  %v3792_v38 = vld [vmem:[%s5077_s0 + $0x40] sm:$0xff]   ;;  %v3793_v43 = vld [vmem:[%s5077_s0 + $0x48] sm:$0xff]  }
  0x10   :  { %v3688_v36 = vunpack.c.h.bf16 %v3791_v33  ;;  %v3687_v37 = vunpack.c.l.bf16 %v3791_v33  ;;  %v3692_v41 = vunpack.c.h.bf16 %v3792_v38  ;;  %v3691_v42 = vunpack.c.l.bf16 %v3792_v38  ;;  %v3794_v48 = vld [vmem:[%s5077_s0 + $0x50] sm:$0xff]   ;;  %v3795_v54 = vld [vmem:[%s5077_s0 + $0x58] sm:$0xff]   ;;  %v3796_v59 = vld [vmem:[%s5077_s0 + $0x60] sm:$0xff]  }
  0x11   :  { %160 = vadd.xlane.f32.xlu1 %v159_v19  ;;  %157 = vadd.xlane.f32.xlu0 %v156_v20  ;;  %v171_v29 = vsel %vm137_vm0, %v3680_v26, 0.0  ;;  %v168_v30 = vsel %vm137_vm0, %v3679_v27, 0.0  ;;  %v177_v34 = vsel %vm137_vm0, %v3684_v31, 0.0  ;;  %v174_v35 = vsel %vm137_vm0, %v3683_v32, 0.0  ;;  %v3797_v0 = vld [vmem:[%s5077_s0 + $0x68] sm:$0xff]   ;;  %v3798_v5 = vld [vmem:[%s5077_s0 + $0x70] sm:$0xff]  }
  0x12   :  { %v183_v39 = vsel %vm137_vm0, %v3688_v36, 0.0  ;;  %v180_v40 = vsel %vm137_vm0, %v3687_v37, 0.0  ;;  %v189_v44 = vsel %vm137_vm0, %v3692_v41, 0.0  ;;  %v186_v45 = vsel %vm137_vm0, %v3691_v42, 0.0  ;;  %v3799_v10 = vld [vmem:[%s5077_s0 + $0x78] sm:$0xff]   ;;  %v3800_v15 = vld [vmem:[%s5077_s0 + $0x80] sm:$0xff]  }
  0x13   :  { %v3696_v46 = vunpack.c.h.bf16 %v3793_v43  ;;  %v3695_v47 = vunpack.c.l.bf16 %v3793_v43  ;;  %v3700_v51 = vunpack.c.h.bf16 %v3794_v48  ;;  %v3699_v52 = vunpack.c.l.bf16 %v3794_v48  ;;  %v3801_v20 = vld [vmem:[%s5077_s0 + $0x88] sm:$0xff]  }
  0x14   :  { %v3846_v53 = vmov 0   ;;  %v3704_v57 = vunpack.c.h.bf16 %v3795_v54  ;;  %v3703_v58 = vunpack.c.l.bf16 %v3795_v54  ;;  %v3708_v62 = vunpack.c.h.bf16 %v3796_v59 }
  0x15   :  { %166 = vadd.xlane.f32.xlu1 %v165_v24  ;;  %163 = vadd.xlane.f32.xlu0 %v162_v25  ;;  %v195_v49 = vsel %vm137_vm0, %v3696_v46, 0.0  ;;  %v192_v50 = vsel %vm137_vm0, %v3695_v47, 0.0  ;;  %v201_v55 = vsel %vm137_vm0, %v3700_v51, 0.0  ;;  %v198_v56 = vsel %vm137_vm0, %v3699_v52, 0.0  ;;  %v3802_v25 = vld [vmem:[%s5077_s0 + $0x90] sm:$0xff]  }
  0x16   :  { %3821 = vset.pattern.permute.xlu1 %v3846_v53  ;;  %3820 = vset.pattern.permute.xlu0 %v3846_v53  ;;  %v207_v60 = vsel %vm137_vm0, %v3704_v57, 0.0  ;;  %v204_v61 = vsel %vm137_vm0, %v3703_v58, 0.0  ;;  %v3707_v63 = vunpack.c.l.bf16 %v3796_v59  ;;  %v213_v1 = vsel %vm137_vm0, %v3708_v62, 0.0 }
  0x17   :  { %v3712_v3 = vunpack.c.h.bf16 %v3797_v0  ;;  %v3711_v4 = vunpack.c.l.bf16 %v3797_v0  ;;  %v3716_v8 = vunpack.c.h.bf16 %v3798_v5  ;;  %v3715_v9 = vunpack.c.l.bf16 %v3798_v5 }
  0x18   :  { %v210_v2 = vsel %vm137_vm0, %v3707_v63, 0.0  ;;  %v3720_v13 = vunpack.c.h.bf16 %v3799_v10  ;;  %v3719_v14 = vunpack.c.l.bf16 %v3799_v10  ;;  %v3724_v18 = vunpack.c.h.bf16 %v3800_v15 }
  0x19   :  { %172 = vadd.xlane.f32.xlu1 %v171_v29  ;;  %169 = vadd.xlane.f32.xlu0 %v168_v30  ;;  %v219_v6 = vsel %vm137_vm0, %v3712_v3, 0.0  ;;  %v216_v7 = vsel %vm137_vm0, %v3711_v4, 0.0  ;;  %v225_v11 = vsel %vm137_vm0, %v3716_v8, 0.0  ;;  %v222_v12 = vsel %vm137_vm0, %v3715_v9, 0.0  ;;  %v3803_v30 = vld [vmem:[%s5077_s0 + $0x98] sm:$0xff]  }
  0x1a   :  { %v231_v16 = vsel %vm137_vm0, %v3720_v13, 0.0  ;;  %v228_v17 = vsel %vm137_vm0, %v3719_v14, 0.0  ;;  %v3723_v19 = vunpack.c.l.bf16 %v3800_v15  ;;  %v237_v21 = vsel %vm137_vm0, %v3724_v18, 0.0 }
  0x1b   :  { %v3728_v23 = vunpack.c.h.bf16 %v3801_v20  ;;  %v3727_v24 = vunpack.c.l.bf16 %v3801_v20  ;;  %v3732_v28 = vunpack.c.h.bf16 %v3802_v25  ;;  %v3731_v29 = vunpack.c.l.bf16 %v3802_v25 }
  0x1c   :  { %v234_v22 = vsel %vm137_vm0, %v3723_v19, 0.0  ;;  %v3736_v33 = vunpack.c.h.bf16 %v3803_v30  ;;  %vm3285_vm1 = vcmask 130112   ;;  %vm3292_vm2 = vcmask 195712  }
  0x1d   :  { %178 = vadd.xlane.f32.xlu1 %v177_v34  ;;  %175 = vadd.xlane.f32.xlu0 %v174_v35  ;;  %v243_v26 = vsel %vm137_vm0, %v3728_v23, 0.0  ;;  %v240_v27 = vsel %vm137_vm0, %v3727_v24, 0.0  ;;  %v249_v31 = vsel %vm137_vm0, %v3732_v28, 0.0  ;;  %v246_v32 = vsel %vm137_vm0, %v3731_v29, 0.0  ;;  %v3804_v35 = vld [vmem:[%s5077_s0 + $0xa0] sm:$0xff]  }
  0x1e   :  { %v3735_v34 = vunpack.c.l.bf16 %v3803_v30  ;;  %v255_v36 = vsel %vm137_vm0, %v3736_v33, 0.0  ;;  %v3740_v38 = vunpack.c.h.bf16 %v3804_v35  ;;  %v458_v33 = vlaneseq }
  0x1f   :  { %vm3299_vm3 = vcmask 261312   ;;  %vm3306_vm4 = vcmask 326912   ;;  %vm3313_vm5 = vcmask 392512   ;;  %vm3320_vm6 = vcmask 458112  }
  0x20   :  { %v252_v37 = vsel %vm137_vm0, %v3735_v34, 0.0  ;;  %v261_v41 = vsel %vm137_vm0, %v3740_v38, 0.0  ;;  %vm3327_vm7 = vcmask 523712   ;;  %vm3334_vm8 = vcmask 589312  }
  0x21   :  { %184 = vadd.xlane.f32.xlu1 %v183_v39  ;;  %181 = vadd.xlane.f32.xlu0 %v180_v40  ;;  %v3739_v39 = vunpack.c.l.bf16 %v3804_v35  ;;  %v3805_v40 = vld [vmem:[%s5077_s0 + $0xa8] sm:$0xff]   ;;  %vm3341_vm9 = vcmask 654912   ;;  %vm3348_vm10 = vcmask 720512   ;;  %vm3355_vm11 = vcmask 786112  }
  0x22   :  { %v3744_v43 = vunpack.c.h.bf16 %v3805_v40  ;;  %vm3362_vm12 = vcmask 851712   ;;  %vm3369_vm13 = vcmask 917312   ;;  %vm3376_vm14 = vcmask 982912  }
  0x23   :  { %v258_v42 = vsel %vm137_vm0, %v3739_v39, 0.0  ;;  %vm3383_vm15 = vcmask 1048512  }
  0x24   :  { %v267_v46 = vsel %vm137_vm0, %v3744_v43, 0.0 }
  0x25   :  { %190 = vadd.xlane.f32.xlu1 %v189_v44  ;;  %187 = vadd.xlane.f32.xlu0 %v186_v45  ;;  %v3743_v44 = vunpack.c.l.bf16 %v3805_v40  ;;  %v3806_v45 = vld [vmem:[%s5077_s0 + $0xb0] sm:$0xff]  }
  0x26   :  { %v3748_v48 = vunpack.c.h.bf16 %v3806_v45 }
  0x27   :  { %v264_v47 = vsel %vm137_vm0, %v3743_v44, 0.0 }
  0x28   :  { %v273_v51 = vsel %vm137_vm0, %v3748_v48, 0.0 }
  0x29   :  { %196 = vadd.xlane.f32.xlu1 %v195_v49  ;;  %193 = vadd.xlane.f32.xlu0 %v192_v50  ;;  %v3747_v49 = vunpack.c.l.bf16 %v3806_v45  ;;  %v3807_v50 = vld [vmem:[%s5077_s0 + $0xb8] sm:$0xff]  }
  0x2a   :  { %v3752_v53 = vunpack.c.h.bf16 %v3807_v50  ;;  %v3751_v54 = vunpack.c.l.bf16 %v3807_v50 }
  0x2b   :  { %v270_v52 = vsel %vm137_vm0, %v3747_v49, 0.0 }
  0x2c   :  { %v276_v57 = vsel %vm137_vm0, %v3751_v54, 0.0 }
  0x2d   :  { %202 = vadd.xlane.f32.xlu1 %v201_v55  ;;  %199 = vadd.xlane.f32.xlu0 %v198_v56  ;;  %v3808_v55 = vld [vmem:[%s5077_s0 + $0xc0] sm:$0xff]   ;;  %v279_v56 = vsel %vm137_vm0, %v3752_v53, 0.0 }
  0x2e   :  { %v3756_v58 = vunpack.c.h.bf16 %v3808_v55  ;;  %v3755_v59 = vunpack.c.l.bf16 %v3808_v55 }
  0x30   :  { %v282_v62 = vsel %vm137_vm0, %v3755_v59, 0.0 }
  0x31   :  { %208 = vadd.xlane.f32.xlu1 %v207_v60  ;;  %205 = vadd.xlane.f32.xlu0 %v204_v61  ;;  %v3809_v60 = vld [vmem:[%s5077_s0 + $0xc8] sm:$0xff]   ;;  %v285_v61 = vsel %vm137_vm0, %v3756_v58, 0.0 }
  0x32   :  { %v3760_v63 = vunpack.c.h.bf16 %v3809_v60  ;;  %v3759_v0 = vunpack.c.l.bf16 %v3809_v60 }
  0x34   :  { %v288_v3 = vsel %vm137_vm0, %v3759_v0, 0.0 }
  0x35   :  { %214 = vadd.xlane.f32.xlu1 %v213_v1  ;;  %211 = vadd.xlane.f32.xlu0 %v210_v2  ;;  %v3810_v1 = vld [vmem:[%s5077_s0 + $0xd0] sm:$0xff]   ;;  %v291_v2 = vsel %vm137_vm0, %v3760_v63, 0.0 }
  0x36   :  { %v3764_v4 = vunpack.c.h.bf16 %v3810_v1  ;;  %v3763_v5 = vunpack.c.l.bf16 %v3810_v1 }
  0x38   :  { %v294_v8 = vsel %vm137_vm0, %v3763_v5, 0.0 }
  0x39   :  { %220 = vadd.xlane.f32.xlu1 %v219_v6  ;;  %217 = vadd.xlane.f32.xlu0 %v216_v7  ;;  %v3811_v6 = vld [vmem:[%s5077_s0 + $0xd8] sm:$0xff]   ;;  %v297_v7 = vsel %vm137_vm0, %v3764_v4, 0.0 }
  0x3a   :  { %v3768_v9 = vunpack.c.h.bf16 %v3811_v6  ;;  %v3767_v10 = vunpack.c.l.bf16 %v3811_v6 }
  0x3c   :  { %v300_v13 = vsel %vm137_vm0, %v3767_v10, 0.0 }
  0x3d   :  { %226 = vadd.xlane.f32.xlu1 %v225_v11  ;;  %223 = vadd.xlane.f32.xlu0 %v222_v12  ;;  %v3812_v11 = vld [vmem:[%s5077_s0 + $0xe0] sm:$0xff]   ;;  %v303_v12 = vsel %vm137_vm0, %v3768_v9, 0.0 }
  0x3e   :  { %v3772_v14 = vunpack.c.h.bf16 %v3812_v11  ;;  %v3771_v15 = vunpack.c.l.bf16 %v3812_v11 }
  0x40   :  { %v306_v18 = vsel %vm137_vm0, %v3771_v15, 0.0 }
  0x41   :  { %232 = vadd.xlane.f32.xlu1 %v231_v16  ;;  %229 = vadd.xlane.f32.xlu0 %v228_v17  ;;  %v3813_v16 = vld [vmem:[%s5077_s0 + $0xe8] sm:$0xff]   ;;  %v309_v17 = vsel %vm137_vm0, %v3772_v14, 0.0 }
  0x42   :  { %v3776_v19 = vunpack.c.h.bf16 %v3813_v16  ;;  %v3775_v20 = vunpack.c.l.bf16 %v3813_v16 }
  0x44   :  { %v312_v23 = vsel %vm137_vm0, %v3775_v20, 0.0 }
  0x45   :  { %238 = vadd.xlane.f32.xlu1 %v237_v21  ;;  %235 = vadd.xlane.f32.xlu0 %v234_v22  ;;  %v3814_v21 = vld [vmem:[%s5077_s0 + $0xf0] sm:$0xff]   ;;  %v315_v22 = vsel %vm137_vm0, %v3776_v19, 0.0 }
  0x46   :  { %v3780_v24 = vunpack.c.h.bf16 %v3814_v21  ;;  %v3779_v25 = vunpack.c.l.bf16 %v3814_v21 }
  0x48   :  { %v318_v28 = vsel %vm137_vm0, %v3779_v25, 0.0 }
  0x49   :  { %244 = vadd.xlane.f32.xlu1 %v243_v26  ;;  %241 = vadd.xlane.f32.xlu0 %v240_v27  ;;  %v3815_v26 = vld [vmem:[%s5077_s0 + $0xf8] sm:$0xff]   ;;  %v321_v27 = vsel %vm137_vm0, %v3780_v24, 0.0  ;;  %s3849_s0 = smov [#allocation2]  }
  0x4a   :  { %v3784_v29 = vunpack.c.h.bf16 %v3815_v26  ;;  %v3783_v30 = vunpack.c.l.bf16 %v3815_v26  ;;  %s3648_s12 = sshll.u32 %s3849_s0, 4  ;;  %s3649_s12 = int_to_ptr.vmem [resolvable:$true] %s3648_s12 }
  0x4b   :  { %s3822_s13 = scalar_lea.vmem %s3649_s12, 32  ;;  %p3827_p1 = scmp.lt.s32.totalorder %s3649_s12, %s3649_s12 }
  0x4c   :  { %p3823_p0 = scmp.ne.s32.totalorder %s3649_s12, %s3822_s13  ;;  %p3828_p2 = scmp.lt.s32.totalorder %s3822_s13, %s3822_s13 }
  0x4d   :  { %250 = vadd.xlane.f32.xlu1 %v249_v31  ;;  %247 = vadd.xlane.f32.xlu0 %v246_v32  ;;  %v327_v31 = vsel %vm137_vm0, %v3784_v29, 0.0  ;;  %v324_v32 = vsel %vm137_vm0, %v3783_v30, 0.0  ;;  %vm3622_vm0 = vcmask 1041409  }
  0x4e   :  { %p3829_p3 = por %p3828_p2, %p3827_p1 }
  0x50   :  { %p3830_p4 = pnand %p3829_p3, %p3823_p0 }
  0x51   :  { %256 = vadd.xlane.f32.xlu1 %v255_v36  ;;  %253 = vadd.xlane.f32.xlu0 %v252_v37  ;;  %v4021_v36 = vshrl.u32 %v458_v33, 7  ;;  %v3847_v37 = vmov 1935823168  }
  0x52   :  { %v1485_v38 = vunpack.c.l.s4 %v3847_v37 }
  0x53   :  { %v4030_v48 = vsub.s32 6, %v4021_v36  ;;  %v4033_v49 = vsub.s32 7, %v4021_v36  ;;  %v4036_v50 = vsub.s32 0, %v4021_v36  ;;  %v4042_v54 = vsub.s32 2, %v4021_v36 }
  0x54   :  { %v1486_v43 = vunpack.c.0.s8 %v1485_v38  ;;  %v4045_v55 = vsub.s32 3, %v4021_v36 }
  0x55   :  { %262 = vadd.xlane.f32.xlu1 %v261_v41  ;;  %259 = vadd.xlane.f32.xlu0 %v258_v42  ;;  %v4024_v42 = vsub.s32 4, %v4021_v36 }
  0x56   :  { %v4048_v58 = vsub.s32 %v1486_v43, %v4021_v36 }
  0x59   :  { %268 = vadd.xlane.f32.xlu1 %v267_v46  ;;  %265 = vadd.xlane.f32.xlu0 %v264_v47  ;;  %v4027_v47 = vsub.s32 5, %v4021_v36 }
  0x5d   :  { %274 = vadd.xlane.f32.xlu1 %v273_v51  ;;  %271 = vadd.xlane.f32.xlu0 %v270_v52  ;;  %v4039_v51 = vsub.s32 1, %v4021_v36 }
  0x61   :  { %280 = vadd.xlane.f32.xlu1 %v279_v56  ;;  %277 = vadd.xlane.f32.xlu0 %v276_v57 }
  0x65   :  { %286 = vadd.xlane.f32.xlu1 %v285_v61  ;;  %283 = vadd.xlane.f32.xlu0 %v282_v62 }
  0x69   :  { %292 = vadd.xlane.f32.xlu1 %v291_v2  ;;  %289 = vadd.xlane.f32.xlu0 %v288_v3 }
  0x6d   :  { %298 = vadd.xlane.f32.xlu1 %v297_v7  ;;  %295 = vadd.xlane.f32.xlu0 %v294_v8 }
  0x71   :  { %304 = vadd.xlane.f32.xlu1 %v303_v12  ;;  %301 = vadd.xlane.f32.xlu0 %v300_v13 }
  0x75   :  { %310 = vadd.xlane.f32.xlu1 %v309_v17  ;;  %307 = vadd.xlane.f32.xlu0 %v306_v18 }
  0x79   :  { %316 = vadd.xlane.f32.xlu1 %v315_v22  ;;  %313 = vadd.xlane.f32.xlu0 %v312_v23 }
  0x7d   :  { %322 = vadd.xlane.f32.xlu1 %v321_v27  ;;  %319 = vadd.xlane.f32.xlu0 %v318_v28 }
  0x81   :  { %328 = vadd.xlane.f32.xlu1 %v327_v31  ;;  %325 = vadd.xlane.f32.xlu0 %v324_v32 }
  0x92   :  { %v146_v34 = vpop.xlane.xlu1 %145  ;;  %v140_v35 = vpop.xlane.xlu0 %139 }
  0x93   :  { %v332_v39 = vmul.f32 0.015625, %v146_v34  ;;  %v330_v44 = vmul.f32 0.015625, %v140_v35 }
  0x96   :  { %v149_v40 = vpop.xlane.xlu1 %148  ;;  %v143_v41 = vpop.xlane.xlu0 %142 }
  0x97   :  { %v333_v45 = vmul.f32 0.015625, %v149_v40  ;;  %v331_v46 = vmul.f32 0.015625, %v143_v41 }
  0x99   :  { %v395_v52 = vpack.c.bf16 %v333_v45, %v332_v39  ;;  %v394_v53 = vpack.c.bf16 %v331_v46, %v330_v44 }
  0x9a   :  { %v155_v56 = vpop.xlane.xlu1 %154  ;;  %v152_v57 = vpop.xlane.xlu0 %151 }
  0x9b   :  { %v335_v59 = vmul.f32 0.015625, %v155_v56  ;;  %v334_v60 = vmul.f32 0.015625, %v152_v57  ;;  %v477_v61 = vrot.slane %v394_v53, %v4024_v42  ;;  %v481_v62 = vrot.slane %v394_v53, %v4027_v47 }
  0x9c   :  { %v485_v63 = vrot.slane %v394_v53, %v4030_v48  ;;  %v489_v0 = vrot.slane %v394_v53, %v4033_v49  ;;  %v461_v1 = vrot.slane %v394_v53, %v4036_v50  ;;  %v465_v2 = vrot.slane %v394_v53, %v4039_v51 }
  0x9d   :  { %v4056_v3 = vpack.c.bf16 %v335_v59, %v334_v60  ;;  %v469_v4 = vrot.slane %v394_v53, %v4042_v54  ;;  %v473_v5 = vrot.slane %v394_v53, %v4045_v55  ;;  %v493_v6 = vrot.slane %v395_v52, %v4036_v50 }
  0x9e   :  { %v161_v7 = vpop.xlane.xlu1 %160  ;;  %v158_v8 = vpop.xlane.xlu0 %157  ;;  %v1506_v9 = vcombine.low %v477_v61, %v485_v63  ;;  %v1507_v10 = vcombine.low %v481_v62, %v489_v0  ;;  %v497_v11 = vrot.slane %v395_v52, %v4039_v51  ;;  %v501_v12 = vrot.slane %v395_v52, %v4042_v54 }
  0x9f   :  { %v337_v13 = vmul.f32 0.015625, %v161_v7  ;;  %v336_v14 = vmul.f32 0.015625, %v158_v8  ;;  %v1482_v15 = vcombine.low %v461_v1, %v469_v4  ;;  %v1483_v16 = vcombine.low %v465_v2, %v473_v5 }
  0xa0   :  { %v1514_v17 = vrot.slane %v1506_v9, %v4048_v58  ;;  %v1521_v18 = vrot.slane %v1507_v10, %v4048_v58  ;;  %v505_v19 = vrot.slane %v395_v52, %v4045_v55  ;;  %v1530_v20 = vcombine.low %v493_v6, %v501_v12 }
  0xa1   :  { %v4066_v21 = vpack.c.bf16 %v337_v13, %v336_v14  ;;  %v1490_v22 = vrot.slane %v1482_v15, %v4048_v58  ;;  %v1497_v23 = vrot.slane %v1483_v16, %v4048_v58  ;;  %v509_v24 = vrot.slane %v395_v52, %v4024_v42 }
  0xa2   :  { %v167_v25 = vpop.xlane.xlu1 %166  ;;  %v164_v26 = vpop.xlane.xlu0 %163  ;;  %v1522_v27 = vcombine.low %v1514_v17, %v1521_v18  ;;  %v1531_v28 = vcombine.low %v497_v11, %v505_v19  ;;  %v1538_v29 = vrot.slane %v1530_v20, %v4048_v58  ;;  %v513_v30 = vrot.slane %v395_v52, %v4027_v47 }
  0xa3   :  { %v339_v31 = vmul.f32 0.015625, %v167_v25  ;;  %v338_v32 = vmul.f32 0.015625, %v164_v26  ;;  %v1498_v34 = vcombine.low %v1490_v22, %v1497_v23  ;;  %v517_v35 = vrot.slane %v395_v52, %v4030_v48 }
  0xa4   :  { %v1529_v37 = vrot.slane %v1522_v27, %v4048_v58  ;;  %v1545_v38 = vrot.slane %v1531_v28, %v4048_v58  ;;  %v521_v39 = vrot.slane %v395_v52, %v4033_v49  ;;  %v525_v40 = vrot.slane %v4056_v3, %v4036_v50 }
  0xa5   :  { %v4079_v41 = vpack.c.bf16 %v339_v31, %v338_v32  ;;  %v1505_v43 = vrot.slane %v1498_v34, %v4048_v58  ;;  %v1554_v44 = vcombine.low %v509_v24, %v517_v35  ;;  %v529_v45 = vrot.slane %v4056_v3, %v4039_v51 }
  0xa6   :  { %v173_v46 = vpop.xlane.xlu1 %172  ;;  %v170_v53 = vpop.xlane.xlu0 %169  ;;  %v3019_v56 = vunpack.c.l.b16 %v1529_v37  ;;  %v1546_v57 = vcombine.low %v1538_v29, %v1545_v38  ;;  %v1555_v59 = vcombine.low %v513_v30, %v521_v39  ;;  %v533_v60 = vrot.slane %v4056_v3, %v4042_v54 }
  0xa7   :  { %v341_v52 = vmul.f32 0.015625, %v173_v46  ;;  %v340_v61 = vmul.f32 0.015625, %v170_v53  ;;  %v3018_v62 = vunpack.c.l.b16 %v1505_v43  ;;  %v1562_v63 = vrot.slane %v1554_v44, %v4048_v58 }
  0xa8   :  { %3086 = vperm.xlu1 %3821, %v3019_v56   ;;  %v1553_v0 = vrot.slane %v1546_v57, %v4048_v58  ;;  %v1569_v1 = vrot.slane %v1555_v59, %v4048_v58  ;;  %v537_v2 = vrot.slane %v4056_v3, %v4045_v55  ;;  %v1578_v4 = vcombine.low %v525_v40, %v533_v60 }
  0xa9   :  { %v4091_v5 = vpack.c.bf16 %v341_v52, %v340_v61  ;;  %3083 = vperm.xlu0 %3820, %v3018_v62   ;;  %v605_v6 = vrot.slane %v4079_v41, %v4024_v42  ;;  %v609_v7 = vrot.slane %v4079_v41, %v4027_v47  ;;  %v613_v8 = vrot.slane %v4079_v41, %v4030_v48 }
  0xaa   :  { %v179_v9 = vpop.xlane.xlu1 %178  ;;  %v176_v10 = vpop.xlane.xlu0 %175  ;;  %v3020_v11 = vunpack.c.l.b16 %v1553_v0  ;;  %v1570_v12 = vcombine.low %v1562_v63, %v1569_v1  ;;  %v1579_v13 = vcombine.low %v529_v45, %v537_v2  ;;  %v1586_v14 = vrot.slane %v1578_v4, %v4048_v58 }
  0xab   :  { %v343_v15 = vmul.f32 0.015625, %v179_v9  ;;  %v342_v16 = vmul.f32 0.015625, %v176_v10  ;;  %v617_v17 = vrot.slane %v4079_v41, %v4033_v49  ;;  %v1698_v18 = vcombine.low %v605_v6, %v613_v8 }
  0xac   :  { %3089 = vperm.xlu1 %3821, %v3020_v11   ;;  %v1577_v19 = vrot.slane %v1570_v12, %v4048_v58  ;;  %v1593_v20 = vrot.slane %v1579_v13, %v4048_v58  ;;  %v541_v22 = vrot.slane %v4056_v3, %v4024_v42  ;;  %v545_v23 = vrot.slane %v4056_v3, %v4027_v47 }
  0xad   :  { %v4108_v24 = vpack.c.bf16 %v343_v15, %v342_v16  ;;  %v1699_v25 = vcombine.low %v609_v7, %v617_v17  ;;  %v1706_v26 = vrot.slane %v1698_v18, %v4048_v58  ;;  %v549_v27 = vrot.slane %v4056_v3, %v4030_v48 }
  0xae   :  { %v185_v28 = vpop.xlane.xlu1 %184  ;;  %v182_v29 = vpop.xlane.xlu0 %181  ;;  %v3021_v30 = vunpack.c.l.b16 %v1577_v19  ;;  %v1594_v31 = vcombine.low %v1586_v14, %v1593_v20  ;;  %v553_v32 = vrot.slane %v4056_v3, %v4033_v49  ;;  %v637_v34 = vrot.slane %v4091_v5, %v4024_v42 }
  0xaf   :  { %v345_v35 = vmul.f32 0.015625, %v185_v28  ;;  %v344_v37 = vmul.f32 0.015625, %v182_v29  ;;  %v1713_v38 = vrot.slane %v1699_v25, %v4048_v58  ;;  %v1602_v39 = vcombine.low %v541_v22, %v549_v27 }
  0xb0   :  { %3092 = vperm.xlu1 %3821, %v3021_v30   ;;  %v1601_v40 = vrot.slane %v1594_v31, %v4048_v58  ;;  %v1603_v43 = vcombine.low %v545_v23, %v553_v32  ;;  %v641_v44 = vrot.slane %v4091_v5, %v4027_v47  ;;  %v645_v45 = vrot.slane %v4091_v5, %v4030_v48 }
  0xb1   :  { %v4123_v46 = vpack.c.bf16 %v345_v35, %v344_v37  ;;  %v1714_v3 = vcombine.low %v1706_v26, %v1713_v38  ;;  %v1610_v53 = vrot.slane %v1602_v39, %v4048_v58  ;;  %v649_v56 = vrot.slane %v4091_v5, %v4033_v49 }
  0xb2   :  { %v191_v57 = vpop.xlane.xlu1 %190  ;;  %v188_v59 = vpop.xlane.xlu0 %187  ;;  %v3022_v60 = vunpack.c.l.b16 %v1601_v40  ;;  %v1617_v52 = vrot.slane %v1603_v43, %v4048_v58  ;;  %v1746_v61 = vcombine.low %v637_v34, %v645_v45  ;;  %v557_v62 = vrot.slane %v4066_v21, %v4036_v50 }
  0xb3   :  { %v347_v63 = vmul.f32 0.015625, %v191_v57  ;;  %v346_v0 = vmul.f32 0.015625, %v188_v59  ;;  %v1721_v1 = vrot.slane %v1714_v3, %v4048_v58  ;;  %v1747_v2 = vcombine.low %v641_v44, %v649_v56 }
  0xb4   :  { %3095 = vperm.xlu1 %3821, %v3022_v60   ;;  %v1618_v4 = vcombine.low %v1610_v53, %v1617_v52  ;;  %v1754_v6 = vrot.slane %v1746_v61, %v4048_v58  ;;  %v561_v7 = vrot.slane %v4066_v21, %v4039_v51  ;;  %v565_v8 = vrot.slane %v4066_v21, %v4042_v54 }
  0xb5   :  { %v4137_v9 = vpack.c.bf16 %v347_v63, %v346_v0  ;;  %v3027_v10 = vunpack.c.l.b16 %v1721_v1  ;;  %v1761_v11 = vrot.slane %v1747_v2, %v4048_v58  ;;  %v569_v12 = vrot.slane %v4066_v21, %v4045_v55 }
  0xb6   :  { %v197_v13 = vpop.xlane.xlu1 %196  ;;  %v194_v14 = vpop.xlane.xlu0 %193  ;;  %v1625_v15 = vrot.slane %v1618_v4, %v4048_v58  ;;  %v1626_v16 = vcombine.low %v557_v62, %v565_v8  ;;  %v669_v17 = vrot.slane %v4108_v24, %v4024_v42  ;;  %v673_v18 = vrot.slane %v4108_v24, %v4027_v47 }
  0xb7   :  { %3110 = vperm.xlu0 %3820, %v3027_v10   ;;  %v349_v19 = vmul.f32 0.015625, %v197_v13  ;;  %v348_v20 = vmul.f32 0.015625, %v194_v14  ;;  %v1762_v22 = vcombine.low %v1754_v6, %v1761_v11  ;;  %v1627_v23 = vcombine.low %v561_v7, %v569_v12 }
  0xb8   :  { %v3023_v25 = vunpack.c.l.b16 %v1625_v15  ;;  %v1634_v26 = vrot.slane %v1626_v16, %v4048_v58  ;;  %v677_v27 = vrot.slane %v4108_v24, %v4030_v48  ;;  %v681_v28 = vrot.slane %v4108_v24, %v4033_v49 }
  0xb9   :  { %v4152_v29 = vpack.c.bf16 %v349_v19, %v348_v20  ;;  %v1769_v30 = vrot.slane %v1762_v22, %v4048_v58  ;;  %v1641_v31 = vrot.slane %v1627_v23, %v4048_v58  ;;  %v573_v32 = vrot.slane %v4066_v21, %v4024_v42 }
  0xba   :  { %3098 = vperm.xlu1 %3821, %v3023_v25   ;;  %v203_v34 = vpop.xlane.xlu1 %202  ;;  %v200_v35 = vpop.xlane.xlu0 %199  ;;  %v1794_v37 = vcombine.low %v669_v17, %v677_v27  ;;  %v1795_v38 = vcombine.low %v673_v18, %v681_v28  ;;  %v577_v39 = vrot.slane %v4066_v21, %v4027_v47  ;;  %v581_v40 = vrot.slane %v4066_v21, %v4030_v48 }
  0xbb   :  { %v3029_v43 = vunpack.c.l.b16 %v1769_v30  ;;  %v351_v44 = vmul.f32 0.015625, %v203_v34  ;;  %v350_v45 = vmul.f32 0.015625, %v200_v35  ;;  %v1642_v3 = vcombine.low %v1634_v26, %v1641_v31 }
  0xbc   :  { %v1802_v53 = vrot.slane %v1794_v37, %v4048_v58  ;;  %v1809_v56 = vrot.slane %v1795_v38, %v4048_v58  ;;  %v585_v57 = vrot.slane %v4066_v21, %v4033_v49  ;;  %v1650_v59 = vcombine.low %v573_v32, %v581_v40 }
  0xbd   :  { %3116 = vperm.xlu0 %3820, %v3029_v43   ;;  %v4166_v60 = vpack.c.bf16 %v351_v44, %v350_v45  ;;  %v1649_v52 = vrot.slane %v1642_v3, %v4048_v58  ;;  %v701_v61 = vrot.slane %v4123_v46, %v4024_v42  ;;  %v705_v62 = vrot.slane %v4123_v46, %v4027_v47 }
  0xbe   :  { %v1810_v63 = vcombine.low %v1802_v53, %v1809_v56  ;;  %v209_v0 = vpop.xlane.xlu1 %208  ;;  %v206_v1 = vpop.xlane.xlu0 %205  ;;  %v1651_v2 = vcombine.low %v577_v39, %v585_v57  ;;  %v1658_v4 = vrot.slane %v1650_v59, %v4048_v58  ;;  %v709_v21 = vrot.slane %v4123_v46, %v4030_v48 }
  0xbf   :  { %v3024_v6 = vunpack.c.l.b16 %v1649_v52  ;;  %v353_v7 = vmul.f32 0.015625, %v209_v0  ;;  %v352_v8 = vmul.f32 0.015625, %v206_v1  ;;  %v713_v10 = vrot.slane %v4123_v46, %v4033_v49 }
  0xc0   :  { %v1817_v11 = vrot.slane %v1810_v63, %v4048_v58  ;;  %v1665_v12 = vrot.slane %v1651_v2, %v4048_v58  ;;  %v1842_v13 = vcombine.low %v701_v61, %v709_v21  ;;  %v589_v14 = vrot.slane %v4079_v41, %v4036_v50 }
  0xc1   :  { %3101 = vperm.xlu1 %3821, %v3024_v6   ;;  %v4182_v15 = vpack.c.bf16 %v353_v7, %v352_v8  ;;  %v1843_v16 = vcombine.low %v705_v62, %v713_v10  ;;  %v593_v17 = vrot.slane %v4079_v41, %v4039_v51  ;;  %v597_v18 = vrot.slane %v4079_v41, %v4042_v54 }
  0xc2   :  { %v3031_v19 = vunpack.c.l.b16 %v1817_v11  ;;  %v1666_v20 = vcombine.low %v1658_v4, %v1665_v12  ;;  %v1850_v22 = vrot.slane %v1842_v13, %v4048_v58  ;;  %v215_v23 = vpop.xlane.xlu1 %214  ;;  %v212_v25 = vpop.xlane.xlu0 %211  ;;  %v601_v26 = vrot.slane %v4079_v41, %v4045_v55 }
  0xc3   :  { %v1857_v27 = vrot.slane %v1843_v16, %v4048_v58  ;;  %v355_v28 = vmul.f32 0.015625, %v215_v23  ;;  %v354_v30 = vmul.f32 0.015625, %v212_v25  ;;  %v1674_v31 = vcombine.low %v589_v14, %v597_v18 }
  0xc4   :  { %3122 = vperm.xlu0 %3820, %v3031_v19   ;;  %v1673_v32 = vrot.slane %v1666_v20, %v4048_v58  ;;  %v1675_v34 = vcombine.low %v593_v17, %v601_v26  ;;  %v733_v35 = vrot.slane %v4137_v9, %v4024_v42  ;;  %v737_v37 = vrot.slane %v4137_v9, %v4027_v47 }
  0xc5   :  { %v1858_v38 = vcombine.low %v1850_v22, %v1857_v27  ;;  %v4197_v39 = vpack.c.bf16 %v355_v28, %v354_v30  ;;  %v1682_v41 = vrot.slane %v1674_v31, %v4048_v58  ;;  %v741_v40 = vrot.slane %v4137_v9, %v4030_v48 }
  0xc6   :  { %v3025_v43 = vunpack.c.l.b16 %v1673_v32  ;;  %v1689_v44 = vrot.slane %v1675_v34, %v4048_v58  ;;  %v745_v45 = vrot.slane %v4137_v9, %v4033_v49  ;;  %v221_v3 = vpop.xlane.xlu1 %220  ;;  %v218_v53 = vpop.xlane.xlu0 %217  ;;  %v621_v56 = vrot.slane %v4091_v5, %v4036_v50 }
  0xc7   :  { %v1865_v57 = vrot.slane %v1858_v38, %v4048_v58  ;;  %v1890_v59 = vcombine.low %v733_v35, %v741_v40  ;;  %v357_v52 = vmul.f32 0.015625, %v221_v3  ;;  %v356_v61 = vmul.f32 0.015625, %v218_v53 }
  0xc8   :  { %3104 = vperm.xlu1 %3821, %v3025_v43   ;;  %v1690_v62 = vcombine.low %v1682_v41, %v1689_v44  ;;  %v1891_v63 = vcombine.low %v737_v37, %v745_v45  ;;  %v625_v0 = vrot.slane %v4091_v5, %v4039_v51  ;;  %v629_v1 = vrot.slane %v4091_v5, %v4042_v54 }
  0xc9   :  { %v3033_v2 = vunpack.c.l.b16 %v1865_v57  ;;  %v1898_v4 = vrot.slane %v1890_v59, %v4048_v58  ;;  %v4213_v21 = vpack.c.bf16 %v357_v52, %v356_v61  ;;  %v633_v6 = vrot.slane %v4091_v5, %v4045_v55 }
  0xca   :  { %v1697_v7 = vrot.slane %v1690_v62, %v4048_v58  ;;  %v1905_v8 = vrot.slane %v1891_v63, %v4048_v58  ;;  %v1722_v10 = vcombine.low %v621_v56, %v629_v1  ;;  %v765_v11 = vrot.slane %v4152_v29, %v4024_v42  ;;  %v227_v12 = vpop.xlane.xlu1 %226  ;;  %v224_v13 = vpop.xlane.xlu0 %223 }
  0xcb   :  { %3128 = vperm.xlu0 %3820, %v3033_v2   ;;  %v1723_v14 = vcombine.low %v625_v0, %v633_v6  ;;  %v769_v16 = vrot.slane %v4152_v29, %v4027_v47  ;;  %v773_v17 = vrot.slane %v4152_v29, %v4030_v48  ;;  %v777_v5 = vrot.slane %v4152_v29, %v4033_v49 }
  0xcc   :  { %v3026_v18 = vunpack.c.l.b16 %v1697_v7  ;;  %v1906_v19 = vcombine.low %v1898_v4, %v1905_v8  ;;  %v1730_v20 = vrot.slane %v1722_v10, %v4048_v58  ;;  %v359_v22 = vmul.f32 0.015625, %v227_v12 }
  0xcd   :  { %v1737_v23 = vrot.slane %v1723_v14, %v4048_v58  ;;  %v1938_v25 = vcombine.low %v765_v11, %v773_v17  ;;  %v1939_v26 = vcombine.low %v769_v16, %v777_v5  ;;  %v358_v27 = vmul.f32 0.015625, %v224_v13 }
  0xce   :  { %3107 = vperm.xlu1 %3821, %v3026_v18   ;;  %v1913_v28 = vrot.slane %v1906_v19, %v4048_v58  ;;  %v653_v30 = vrot.slane %v4108_v24, %v4036_v50  ;;  %v657_v31 = vrot.slane %v4108_v24, %v4039_v51  ;;  %v661_v32 = vrot.slane %v4108_v24, %v4042_v54  ;;  %v233_v34 = vpop.xlane.xlu1 %232  ;;  %v230_v35 = vpop.xlane.xlu0 %229 }
  0xcf   :  { %v1738_v37 = vcombine.low %v1730_v20, %v1737_v23  ;;  %v1946_v38 = vrot.slane %v1938_v25, %v4048_v58  ;;  %v1953_v41 = vrot.slane %v1939_v26, %v4048_v58  ;;  %v4238_v40 = vpack.c.bf16 %v359_v22, %v358_v27 }
  0xd0   :  { %v3035_v43 = vunpack.c.l.b16 %v1913_v28  ;;  %v665_v44 = vrot.slane %v4108_v24, %v4045_v55  ;;  %v1770_v45 = vcombine.low %v653_v30, %v661_v32  ;;  %v797_v3 = vrot.slane %v4166_v60, %v4024_v42 }
  0xd1   :  { %v1745_v53 = vrot.slane %v1738_v37, %v4048_v58  ;;  %v1954_v56 = vcombine.low %v1946_v38, %v1953_v41  ;;  %v801_v57 = vrot.slane %v4166_v60, %v4027_v47  ;;  %v805_v59 = vrot.slane %v4166_v60, %v4030_v48 }
  0xd2   :  { %3134 = vperm.xlu0 %3820, %v3035_v43   ;;  %v1771_v52 = vcombine.low %v657_v31, %v665_v44  ;;  %v1778_v61 = vrot.slane %v1770_v45, %v4048_v58  ;;  %v809_v24 = vrot.slane %v4166_v60, %v4033_v49  ;;  %v361_v62 = vmul.f32 0.015625, %v233_v34  ;;  %v239_v63 = vpop.xlane.xlu1 %238  ;;  %v236_v0 = vpop.xlane.xlu0 %235 }
  0xd3   :  { %v3028_v1 = vunpack.c.l.b16 %v1745_v53  ;;  %v1961_v2 = vrot.slane %v1954_v56, %v4048_v58  ;;  %v1986_v4 = vcombine.low %v797_v3, %v805_v59  ;;  %v360_v6 = vmul.f32 0.015625, %v230_v35 }
  0xd4   :  { %v1785_v7 = vrot.slane %v1771_v52, %v4048_v58  ;;  %v1987_v8 = vcombine.low %v801_v57, %v809_v24  ;;  %v685_v10 = vrot.slane %v4123_v46, %v4036_v50  ;;  %v689_v11 = vrot.slane %v4123_v46, %v4039_v51 }
  0xd5   :  { %3113 = vperm.xlu1 %3821, %v3028_v1   ;;  %v3037_v12 = vunpack.c.l.b16 %v1961_v2  ;;  %v1994_v13 = vrot.slane %v1986_v4, %v4048_v58  ;;  %v4259_v14 = vpack.c.bf16 %v361_v62, %v360_v6  ;;  %v693_v16 = vrot.slane %v4123_v46, %v4042_v54 }
  0xd6   :  { %v1786_v17 = vcombine.low %v1778_v61, %v1785_v7  ;;  %v2001_v5 = vrot.slane %v1987_v8, %v4048_v58  ;;  %v697_v18 = vrot.slane %v4123_v46, %v4045_v55  ;;  %v829_v19 = vrot.slane %v4182_v15, %v4024_v42  ;;  %v245_v20 = vpop.xlane.xlu1 %244  ;;  %v242_v27 = vpop.xlane.xlu0 %241 }
  0xd7   :  { %3140 = vperm.xlu0 %3820, %v3037_v12   ;;  %v1818_v22 = vcombine.low %v685_v10, %v693_v16  ;;  %v833_v23 = vrot.slane %v4182_v15, %v4027_v47  ;;  %v837_v25 = vrot.slane %v4182_v15, %v4030_v48  ;;  %v841_v26 = vrot.slane %v4182_v15, %v4033_v49 }
  0xd8   :  { %v1793_v28 = vrot.slane %v1786_v17, %v4048_v58  ;;  %v2002_v30 = vcombine.low %v1994_v13, %v2001_v5  ;;  %v1819_v46 = vcombine.low %v689_v11, %v697_v18  ;;  %v363_v31 = vmul.f32 0.015625, %v239_v63 }
  0xd9   :  { %v1826_v32 = vrot.slane %v1818_v22, %v4048_v58  ;;  %v2034_v34 = vcombine.low %v829_v19, %v837_v25  ;;  %v2035_v35 = vcombine.low %v833_v23, %v841_v26  ;;  %v362_v37 = vmul.f32 0.015625, %v236_v0 }
  0xda   :  { %v3030_v38 = vunpack.c.l.b16 %v1793_v28  ;;  %v2009_v41 = vrot.slane %v2002_v30, %v4048_v58  ;;  %v1833_v43 = vrot.slane %v1819_v46, %v4048_v58  ;;  %v717_v44 = vrot.slane %v4137_v9, %v4036_v50  ;;  %v251_v45 = vpop.xlane.xlu1 %250  ;;  %v248_v2 = vpop.xlane.xlu0 %247 }
  0xdb   :  { %v2042_v3 = vrot.slane %v2034_v34, %v4048_v58  ;;  %v2049_v53 = vrot.slane %v2035_v35, %v4048_v58  ;;  %v4282_v56 = vpack.c.bf16 %v363_v31, %v362_v37  ;;  %v721_v57 = vrot.slane %v4137_v9, %v4039_v51 }
  0xdc   :  { %3119 = vperm.xlu1 %3821, %v3030_v38   ;;  %v3039_v59 = vunpack.c.l.b16 %v2009_v41  ;;  %v1834_v52 = vcombine.low %v1826_v32, %v1833_v43  ;;  %v725_v61 = vrot.slane %v4137_v9, %v4042_v54  ;;  %v729_v24 = vrot.slane %v4137_v9, %v4045_v55 }
  0xdd   :  { %v2050_v62 = vcombine.low %v2042_v3, %v2049_v53  ;;  %v861_v63 = vrot.slane %v4197_v39, %v4024_v42  ;;  %v865_v0 = vrot.slane %v4197_v39, %v4027_v47  ;;  %v869_v1 = vrot.slane %v4197_v39, %v4030_v48 }
  0xde   :  { %3146 = vperm.xlu0 %3820, %v3039_v59   ;;  %v1841_v4 = vrot.slane %v1834_v52, %v4048_v58  ;;  %v1866_v6 = vcombine.low %v717_v44, %v725_v61  ;;  %v1867_v7 = vcombine.low %v721_v57, %v729_v24  ;;  %v873_v8 = vrot.slane %v4197_v39, %v4033_v49  ;;  %v257_v13 = vpop.xlane.xlu1 %256  ;;  %v254_v34 = vpop.xlane.xlu0 %253 }
  0xdf   :  { %v2057_v9 = vrot.slane %v2050_v62, %v4048_v58  ;;  %v2082_v10 = vcombine.low %v861_v63, %v869_v1  ;;  %v365_v11 = vmul.f32 0.015625, %v245_v20  ;;  %v364_v12 = vmul.f32 0.015625, %v242_v27 }
  0xe0   :  { %v3032_v16 = vunpack.c.l.b16 %v1841_v4  ;;  %v1874_v17 = vrot.slane %v1866_v6, %v4048_v58  ;;  %v1881_v5 = vrot.slane %v1867_v7, %v4048_v58  ;;  %v2083_v18 = vcombine.low %v865_v0, %v873_v8 }
  0xe1   :  { %v3041_v19 = vunpack.c.l.b16 %v2057_v9  ;;  %v2090_v22 = vrot.slane %v2082_v10, %v4048_v58  ;;  %v4303_v23 = vpack.c.bf16 %v365_v11, %v364_v12  ;;  %v749_v25 = vrot.slane %v4152_v29, %v4036_v50 }
  0xe2   :  { %3125 = vperm.xlu1 %3821, %v3032_v16   ;;  %v1882_v26 = vcombine.low %v1874_v17, %v1881_v5  ;;  %v2097_v20 = vrot.slane %v2083_v18, %v4048_v58  ;;  %v753_v27 = vrot.slane %v4152_v29, %v4039_v51  ;;  %v757_v28 = vrot.slane %v4152_v29, %v4042_v54  ;;  %v263_v53 = vpop.xlane.xlu1 %262  ;;  %v260_v10 = vpop.xlane.xlu0 %259 }
  0xe3   :  { %3152 = vperm.xlu0 %3820, %v3041_v19   ;;  %v761_v30 = vrot.slane %v4152_v29, %v4045_v55  ;;  %v893_v46 = vrot.slane %v4213_v21, %v4024_v42  ;;  %v897_v31 = vrot.slane %v4213_v21, %v4027_v47  ;;  %v901_v32 = vrot.slane %v4213_v21, %v4030_v48 }
  0xe4   :  { %v1889_v35 = vrot.slane %v1882_v26, %v4048_v58  ;;  %v2098_v37 = vcombine.low %v2090_v22, %v2097_v20  ;;  %v1914_v38 = vcombine.low %v749_v25, %v757_v28  ;;  %v905_v41 = vrot.slane %v4213_v21, %v4033_v49 }
  0xe5   :  { %v1915_v43 = vcombine.low %v753_v27, %v761_v30  ;;  %v2130_v44 = vcombine.low %v893_v46, %v901_v32  ;;  %v367_v29 = vmul.f32 0.015625, %v251_v45  ;;  %v366_v3 = vmul.f32 0.015625, %v248_v2 }
  0xe6   :  { %v3034_v57 = vunpack.c.l.b16 %v1889_v35  ;;  %v2105_v59 = vrot.slane %v2098_v37, %v4048_v58  ;;  %v1922_v52 = vrot.slane %v1914_v38, %v4048_v58  ;;  %v2131_v61 = vcombine.low %v897_v31, %v905_v41  ;;  %v269_v22 = vpop.xlane.xlu1 %268 }
  0xe7   :  { %v1929_v24 = vrot.slane %v1915_v43, %v4048_v58  ;;  %v2138_v62 = vrot.slane %v2130_v44, %v4048_v58  ;;  %v4327_v63 = vpack.c.bf16 %v367_v29, %v366_v3  ;;  %v781_v0 = vrot.slane %v4166_v60, %v4036_v50  ;;  %v266_v44 = vpop.xlane.xlu0 %265 }
  0xe8   :  { %3131 = vperm.xlu1 %3821, %v3034_v57   ;;  %v3043_v1 = vunpack.c.l.b16 %v2105_v59  ;;  %v2145_v45 = vrot.slane %v2131_v61, %v4048_v58  ;;  %v785_v2 = vrot.slane %v4166_v60, %v4039_v51  ;;  %v789_v4 = vrot.slane %v4166_v60, %v4042_v54 }
  0xe9   :  { %v1930_v6 = vcombine.low %v1922_v52, %v1929_v24  ;;  %v793_v7 = vrot.slane %v4166_v60, %v4045_v55  ;;  %v925_v8 = vrot.slane %v4238_v40, %v4024_v42  ;;  %v929_v9 = vrot.slane %v4238_v40, %v4027_v47 }
  0xea   :  { %3158 = vperm.xlu0 %3820, %v3043_v1   ;;  %v2146_v11 = vcombine.low %v2138_v62, %v2145_v45  ;;  %v1962_v12 = vcombine.low %v781_v0, %v789_v4  ;;  %v933_v16 = vrot.slane %v4238_v40, %v4030_v48  ;;  %v937_v17 = vrot.slane %v4238_v40, %v4033_v49  ;;  %v275_v62 = vpop.xlane.xlu1 %274 }
  0xeb   :  { %v1937_v5 = vrot.slane %v1930_v6, %v4048_v58  ;;  %v1963_v18 = vcombine.low %v785_v2, %v793_v7  ;;  %v369_v60 = vmul.f32 0.015625, %v257_v13  ;;  %v368_v19 = vmul.f32 0.015625, %v254_v34 }
  0xec   :  { %v2153_v25 = vrot.slane %v2146_v11, %v4048_v58  ;;  %v1970_v26 = vrot.slane %v1962_v12, %v4048_v58  ;;  %v2178_v20 = vcombine.low %v925_v8, %v933_v16  ;;  %v2179_v27 = vcombine.low %v929_v9, %v937_v17 }
  0xed   :  { %v3036_v28 = vunpack.c.l.b16 %v1937_v5  ;;  %v1977_v30 = vrot.slane %v1963_v18, %v4048_v58  ;;  %v4350_v46 = vpack.c.bf16 %v369_v60, %v368_v19  ;;  %v813_v31 = vrot.slane %v4182_v15, %v4036_v50  ;;  %v272_v18 = vpop.xlane.xlu0 %271 }
  0xee   :  { %v3045_v32 = vunpack.c.l.b16 %v2153_v25  ;;  %v2186_v35 = vrot.slane %v2178_v20, %v4048_v58  ;;  %v2193_v13 = vrot.slane %v2179_v27, %v4048_v58  ;;  %v817_v34 = vrot.slane %v4182_v15, %v4039_v51 }
  0xef   :  { %3137 = vperm.xlu1 %3821, %v3036_v28   ;;  %v1978_v37 = vcombine.low %v1970_v26, %v1977_v30  ;;  %v821_v38 = vrot.slane %v4182_v15, %v4042_v54  ;;  %v825_v41 = vrot.slane %v4182_v15, %v4045_v55  ;;  %v957_v43 = vrot.slane %v4259_v14, %v4024_v42 }
  0xf0   :  { %3164 = vperm.xlu0 %3820, %v3045_v32   ;;  %v2194_v29 = vcombine.low %v2186_v35, %v2193_v13  ;;  %v961_v3 = vrot.slane %v4259_v14, %v4027_v47  ;;  %v965_v57 = vrot.slane %v4259_v14, %v4030_v48  ;;  %v969_v59 = vrot.slane %v4259_v14, %v4033_v49 }
  0xf1   :  { %v1985_v52 = vrot.slane %v1978_v37, %v4048_v58  ;;  %v2010_v61 = vcombine.low %v813_v31, %v821_v38  ;;  %v2011_v24 = vcombine.low %v817_v34, %v825_v41  ;;  %v371_v15 = vmul.f32 0.015625, %v263_v53 }
  0xf2   :  { %v2201_v0 = vrot.slane %v2194_v29, %v4048_v58  ;;  %v2226_v1 = vcombine.low %v957_v43, %v965_v57  ;;  %v2227_v45 = vcombine.low %v961_v3, %v969_v59  ;;  %v370_v2 = vmul.f32 0.015625, %v260_v10 }
  0xf3   :  { %v3038_v4 = vunpack.c.l.b16 %v1985_v52  ;;  %v2018_v6 = vrot.slane %v2010_v61, %v4048_v58  ;;  %v2025_v7 = vrot.slane %v2011_v24, %v4048_v58  ;;  %v845_v8 = vrot.slane %v4197_v39, %v4036_v50  ;;  %v278_v61 = vpop.xlane.xlu0 %277 }
  0xf4   :  { %v3047_v9 = vunpack.c.l.b16 %v2201_v0  ;;  %v2234_v11 = vrot.slane %v2226_v1, %v4048_v58  ;;  %v2241_v12 = vrot.slane %v2227_v45, %v4048_v58  ;;  %v4378_v53 = vpack.c.bf16 %v371_v15, %v370_v2 }
  0xf5   :  { %3143 = vperm.xlu1 %3821, %v3038_v4   ;;  %v2026_v16 = vcombine.low %v2018_v6, %v2025_v7  ;;  %v849_v10 = vrot.slane %v4197_v39, %v4039_v51  ;;  %v853_v17 = vrot.slane %v4197_v39, %v4042_v54  ;;  %v857_v5 = vrot.slane %v4197_v39, %v4045_v55  ;;  %v281_v39 = vpop.xlane.xlu1 %280 }
  0xf6   :  { %3170 = vperm.xlu0 %3820, %v3047_v9   ;;  %v2242_v60 = vcombine.low %v2234_v11, %v2241_v12  ;;  %v989_v19 = vrot.slane %v4282_v56, %v4024_v42  ;;  %v993_v25 = vrot.slane %v4282_v56, %v4027_v47  ;;  %v997_v26 = vrot.slane %v4282_v56, %v4030_v48 }
  0xf7   :  { %v2033_v20 = vrot.slane %v2026_v16, %v4048_v58  ;;  %v2058_v27 = vcombine.low %v845_v8, %v853_v17  ;;  %v2059_v28 = vcombine.low %v849_v10, %v857_v5  ;;  %v1001_v30 = vrot.slane %v4282_v56, %v4033_v49 }
  0xf8   :  { %v2249_v31 = vrot.slane %v2242_v60, %v4048_v58  ;;  %v2274_v32 = vcombine.low %v989_v19, %v997_v26  ;;  %v373_v35 = vmul.f32 0.015625, %v269_v22  ;;  %v372_v13 = vmul.f32 0.015625, %v266_v44 }
  0xf9   :  { %v3040_v34 = vunpack.c.l.b16 %v2033_v20  ;;  %v2066_v37 = vrot.slane %v2058_v27, %v4048_v58  ;;  %v2073_v38 = vrot.slane %v2059_v28, %v4048_v58  ;;  %v2275_v41 = vcombine.low %v993_v25, %v1001_v30  ;;  %v287_v7 = vpop.xlane.xlu1 %286  ;;  %v284_v27 = vpop.xlane.xlu0 %283 }
  0xfa   :  { %v3049_v43 = vunpack.c.l.b16 %v2249_v31  ;;  %v2282_v29 = vrot.slane %v2274_v32, %v4048_v58  ;;  %v4399_v3 = vpack.c.bf16 %v373_v35, %v372_v13  ;;  %v877_v57 = vrot.slane %v4213_v21, %v4036_v50 }
  0xfb   :  { %3149 = vperm.xlu1 %3821, %v3040_v34   ;;  %v2074_v59 = vcombine.low %v2066_v37, %v2073_v38  ;;  %v2289_v52 = vrot.slane %v2275_v41, %v4048_v58  ;;  %v881_v22 = vrot.slane %v4213_v21, %v4039_v51  ;;  %v885_v44 = vrot.slane %v4213_v21, %v4042_v54 }
  0xfc   :  { %3176 = vperm.xlu0 %3820, %v3049_v43   ;;  %v889_v24 = vrot.slane %v4213_v21, %v4045_v55  ;;  %v1021_v15 = vrot.slane %v4303_v23, %v4024_v42  ;;  %v1025_v0 = vrot.slane %v4303_v23, %v4027_v47  ;;  %v1029_v1 = vrot.slane %v4303_v23, %v4030_v48 }
  0xfd   :  { %v2081_v45 = vrot.slane %v2074_v59, %v4048_v58  ;;  %v2290_v2 = vcombine.low %v2282_v29, %v2289_v52  ;;  %v2106_v4 = vcombine.low %v877_v57, %v885_v44  ;;  %v1033_v6 = vrot.slane %v4303_v23, %v4033_v49  ;;  %v4442_v38 = vpop.xlane.xlu1 %292 }
  0xfe   :  { %v2107_v8 = vcombine.low %v881_v22, %v889_v24  ;;  %v2322_v9 = vcombine.low %v1021_v15, %v1029_v1  ;;  %v375_v21 = vmul.f32 0.015625, %v275_v62  ;;  %v374_v11 = vmul.f32 0.015625, %v272_v18 }
  0xff   :  { %v3042_v12 = vunpack.c.l.b16 %v2081_v45  ;;  %v2297_v16 = vrot.slane %v2290_v2, %v4048_v58  ;;  %v2114_v10 = vrot.slane %v2106_v4, %v4048_v58  ;;  %v2323_v17 = vcombine.low %v1025_v0, %v1033_v6  ;;  %v290_v2 = vpop.xlane.xlu0 %289 }
 0x100   :  { %v2121_v5 = vrot.slane %v2107_v8, %v4048_v58  ;;  %v2330_v60 = vrot.slane %v2322_v9, %v4048_v58  ;;  %v4423_v19 = vpack.c.bf16 %v375_v21, %v374_v11  ;;  %v909_v25 = vrot.slane %v4238_v40, %v4036_v50 }
 0x101   :  { %3155 = vperm.xlu1 %3821, %v3042_v12   ;;  %v3051_v26 = vunpack.c.l.b16 %v2297_v16  ;;  %v2337_v62 = vrot.slane %v2323_v17, %v4048_v58  ;;  %v913_v18 = vrot.slane %v4238_v40, %v4039_v51  ;;  %v917_v20 = vrot.slane %v4238_v40, %v4042_v54 }
 0x102   :  { %v2122_v28 = vcombine.low %v2114_v10, %v2121_v5  ;;  %v921_v30 = vrot.slane %v4238_v40, %v4045_v55  ;;  %v1053_v31 = vrot.slane %v4327_v63, %v4024_v42  ;;  %v1057_v32 = vrot.slane %v4327_v63, %v4027_v47  ;;  %v299_v10 = vpop.xlane.xlu1 %298 }
 0x103   :  { %3182 = vperm.xlu0 %3820, %v3051_v26   ;;  %v2338_v35 = vcombine.low %v2330_v60, %v2337_v62  ;;  %v2154_v13 = vcombine.low %v909_v25, %v917_v20  ;;  %v1061_v34 = vrot.slane %v4327_v63, %v4030_v48  ;;  %v1065_v37 = vrot.slane %v4327_v63, %v4033_v49 }
 0x104   :  { %v2129_v41 = vrot.slane %v2122_v28, %v4048_v58  ;;  %v2155_v40 = vcombine.low %v913_v18, %v921_v30  ;;  %v377_v43 = vmul.f32 0.015625, %v281_v39  ;;  %v376_v29 = vmul.f32 0.015625, %v278_v61 }
 0x105   :  { %v2345_v57 = vrot.slane %v2338_v35, %v4048_v58  ;;  %v2162_v59 = vrot.slane %v2154_v13, %v4048_v58  ;;  %v2370_v52 = vcombine.low %v1053_v31, %v1061_v34  ;;  %v2371_v22 = vcombine.low %v1057_v32, %v1065_v37 }
 0x106   :  { %v3044_v44 = vunpack.c.l.b16 %v2129_v41  ;;  %v2169_v24 = vrot.slane %v2155_v40, %v4048_v58  ;;  %v4448_v15 = vpack.c.bf16 %v377_v43, %v376_v29  ;;  %v941_v0 = vrot.slane %v4259_v14, %v4036_v50 }
 0x107   :  { %v3053_v1 = vunpack.c.l.b16 %v2345_v57  ;;  %v2378_v45 = vrot.slane %v2370_v52, %v4048_v58  ;;  %v2385_v39 = vrot.slane %v2371_v22, %v4048_v58  ;;  %v945_v61 = vrot.slane %v4259_v14, %v4039_v51  ;;  %v305_v52 = vpop.xlane.xlu1 %304 }
 0x108   :  { %3161 = vperm.xlu1 %3821, %v3044_v44   ;;  %v2170_v4 = vcombine.low %v2162_v59, %v2169_v24  ;;  %v949_v6 = vrot.slane %v4259_v14, %v4042_v54  ;;  %v953_v8 = vrot.slane %v4259_v14, %v4045_v55  ;;  %v1085_v9 = vrot.slane %v4350_v46, %v4024_v42 }
 0x109   :  { %3188 = vperm.xlu0 %3820, %v3053_v1   ;;  %v2386_v21 = vcombine.low %v2378_v45, %v2385_v39  ;;  %v1089_v11 = vrot.slane %v4350_v46, %v4027_v47  ;;  %v1093_v12 = vrot.slane %v4350_v46, %v4030_v48  ;;  %v1097_v16 = vrot.slane %v4350_v46, %v4033_v49 }
 0x10a   :  { %v2177_v17 = vrot.slane %v2170_v4, %v4048_v58  ;;  %v2202_v5 = vcombine.low %v941_v0, %v949_v6  ;;  %v2203_v60 = vcombine.low %v945_v61, %v953_v8  ;;  %v379_v14 = vmul.f32 0.015625, %v287_v7  ;;  %v296_v7 = vpop.xlane.xlu0 %295 }
 0x10b   :  { %v2393_v25 = vrot.slane %v2386_v21, %v4048_v58  ;;  %v2418_v26 = vcombine.low %v1085_v9, %v1093_v12  ;;  %v2419_v62 = vcombine.low %v1089_v11, %v1097_v16  ;;  %v378_v18 = vmul.f32 0.015625, %v284_v27 }
 0x10c   :  { %v3046_v20 = vunpack.c.l.b16 %v2177_v17  ;;  %v2210_v28 = vrot.slane %v2202_v5, %v4048_v58  ;;  %v2217_v30 = vrot.slane %v2203_v60, %v4048_v58  ;;  %v973_v31 = vrot.slane %v4282_v56, %v4036_v50 }
 0x10d   :  { %v3055_v32 = vunpack.c.l.b16 %v2393_v25  ;;  %v2426_v35 = vrot.slane %v2418_v26, %v4048_v58  ;;  %v2433_v13 = vrot.slane %v2419_v62, %v4048_v58  ;;  %v4476_v34 = vpack.c.bf16 %v379_v14, %v378_v18  ;;  %v311_v62 = vpop.xlane.xlu1 %310 }
 0x10e   :  { %3167 = vperm.xlu1 %3821, %v3046_v20   ;;  %v2218_v37 = vcombine.low %v2210_v28, %v2217_v30  ;;  %v977_v27 = vrot.slane %v4282_v56, %v4039_v51  ;;  %v981_v41 = vrot.slane %v4282_v56, %v4042_v54  ;;  %v985_v40 = vrot.slane %v4282_v56, %v4045_v55  ;;  %v302_v16 = vpop.xlane.xlu0 %301 }
 0x10f   :  { %3194 = vperm.xlu0 %3820, %v3055_v32   ;;  %v2434_v43 = vcombine.low %v2426_v35, %v2433_v13  ;;  %v1117_v29 = vrot.slane %v4378_v53, %v4024_v42  ;;  %v1121_v57 = vrot.slane %v4378_v53, %v4027_v47  ;;  %v1125_v59 = vrot.slane %v4378_v53, %v4030_v48 }
 0x110   :  { %v2225_v22 = vrot.slane %v2218_v37, %v4048_v58  ;;  %v2250_v44 = vcombine.low %v973_v31, %v981_v41  ;;  %v2251_v24 = vcombine.low %v977_v27, %v985_v40  ;;  %v1129_v0 = vrot.slane %v4378_v53, %v4033_v49 }
 0x111   :  { %v2441_v56 = vrot.slane %v2434_v43, %v4048_v58  ;;  %v2466_v1 = vcombine.low %v1117_v29, %v1125_v59  ;;  %v381_v45 = vmul.f32 0.015625, %v4442_v38  ;;  %v380_v39 = vmul.f32 0.015625, %v290_v2 }
 0x112   :  { %v3048_v61 = vunpack.c.l.b16 %v2225_v22  ;;  %v2258_v4 = vrot.slane %v2250_v44, %v4048_v58  ;;  %v2265_v6 = vrot.slane %v2251_v24, %v4048_v58  ;;  %v2467_v8 = vcombine.low %v1121_v57, %v1129_v0  ;;  %v308_v29 = vpop.xlane.xlu0 %307 }
 0x113   :  { %v3057_v9 = vunpack.c.l.b16 %v2441_v56  ;;  %v2474_v21 = vrot.slane %v2466_v1, %v4048_v58  ;;  %v4498_v11 = vpack.c.bf16 %v381_v45, %v380_v39  ;;  %v1005_v12 = vrot.slane %v4303_v23, %v4036_v50  ;;  %v317_v56 = vpop.xlane.xlu1 %316 }
 0x114   :  { %3173 = vperm.xlu1 %3821, %v3048_v61   ;;  %v2266_v17 = vcombine.low %v2258_v4, %v2265_v6  ;;  %v2481_v38 = vrot.slane %v2467_v8, %v4048_v58  ;;  %v1009_v2 = vrot.slane %v4303_v23, %v4039_v51  ;;  %v1013_v5 = vrot.slane %v4303_v23, %v4042_v54 }
 0x115   :  { %3200 = vperm.xlu0 %3820, %v3057_v9   ;;  %v1017_v60 = vrot.slane %v4303_v23, %v4045_v55  ;;  %v383_v14 = vmul.f32 0.015625, %v299_v10  ;;  %v382_v25 = vmul.f32 0.015625, %v296_v7  ;;  %v1037_v26 = vrot.slane %v4327_v63, %v4036_v50 }
 0x116   :  { %v2273_v18 = vrot.slane %v2266_v17, %v4048_v58  ;;  %v2482_v20 = vcombine.low %v2474_v21, %v2481_v38  ;;  %v2298_v28 = vcombine.low %v1005_v12, %v1013_v5  ;;  %v1041_v30 = vrot.slane %v4327_v63, %v4039_v51 }
 0x117   :  { %v2299_v31 = vcombine.low %v1009_v2, %v1017_v60  ;;  %v4514_v32 = vpack.c.bf16 %v383_v14, %v382_v25  ;;  %v1045_v35 = vrot.slane %v4327_v63, %v4042_v54  ;;  %v1049_v23 = vrot.slane %v4327_v63, %v4045_v55  ;;  %v314_v60 = vpop.xlane.xlu0 %313  ;;  %v4550_v14 = vpop.xlane.xlu1 %322 }
 0x118   :  { %v3050_v10 = vunpack.c.l.b16 %v2273_v18  ;;  %v2489_v13 = vrot.slane %v2482_v20, %v4048_v58  ;;  %v2306_v7 = vrot.slane %v2298_v28, %v4048_v58  ;;  %v385_v37 = vmul.f32 0.015625, %v305_v52 }
 0x119   :  { %v2313_v27 = vrot.slane %v2299_v31, %v4048_v58  ;;  %v2346_v41 = vcombine.low %v1037_v26, %v1045_v35  ;;  %v2347_v40 = vcombine.low %v1041_v30, %v1049_v23  ;;  %v384_v43 = vmul.f32 0.015625, %v302_v16 }
 0x11a   :  { %3179 = vperm.xlu1 %3821, %v3050_v10   ;;  %v3059_v57 = vunpack.c.l.b16 %v2489_v13  ;;  %v1069_v59 = vrot.slane %v4350_v46, %v4036_v50  ;;  %v1073_v63 = vrot.slane %v4350_v46, %v4039_v51  ;;  %v1077_v22 = vrot.slane %v4350_v46, %v4042_v54 }
 0x11b   :  { %v2314_v44 = vcombine.low %v2306_v7, %v2313_v27  ;;  %v2354_v52 = vrot.slane %v2346_v41, %v4048_v58  ;;  %v2361_v24 = vrot.slane %v2347_v40, %v4048_v58  ;;  %v4531_v0 = vpack.c.bf16 %v385_v37, %v384_v43  ;;  %v4565_v41 = vpop.xlane.xlu1 %328 }
 0x11c   :  { %3206 = vperm.xlu0 %3820, %v3059_v57   ;;  %v1081_v1 = vrot.slane %v4350_v46, %v4045_v55  ;;  %v2394_v45 = vcombine.low %v1069_v59, %v1077_v22  ;;  %v387_v39 = vmul.f32 0.015625, %v311_v62  ;;  %v386_v61 = vmul.f32 0.015625, %v308_v29 }
 0x11d   :  { %v2321_v4 = vrot.slane %v2314_v44, %v4048_v58  ;;  %v2362_v6 = vcombine.low %v2354_v52, %v2361_v24  ;;  %v1101_v8 = vrot.slane %v4378_v53, %v4036_v50  ;;  %v1105_v9 = vrot.slane %v4378_v53, %v4039_v51 }
 0x11e   :  { %v2395_v21 = vcombine.low %v1073_v63, %v1081_v1  ;;  %v2402_v12 = vrot.slane %v2394_v45, %v4048_v58  ;;  %v4541_v16 = vpack.c.bf16 %v387_v39, %v386_v61  ;;  %v1109_v46 = vrot.slane %v4378_v53, %v4042_v54 }
 0x11f   :  { %v3052_v17 = vunpack.c.l.b16 %v2321_v4  ;;  %v2369_v38 = vrot.slane %v2362_v6, %v4048_v58  ;;  %v1113_v2 = vrot.slane %v4378_v53, %v4045_v55  ;;  %v1245_v5 = vrot.slane %v4476_v34, %v4024_v42 }
 0x120   :  { %v2409_v25 = vrot.slane %v2395_v21, %v4048_v58  ;;  %v2442_v26 = vcombine.low %v1101_v8, %v1109_v46  ;;  %v1249_v62 = vrot.slane %v4476_v34, %v4027_v47  ;;  %v1253_v18 = vrot.slane %v4476_v34, %v4030_v48 }
 0x121   :  { %3185 = vperm.xlu1 %3821, %v3052_v17   ;;  %v3054_v20 = vunpack.c.l.b16 %v2369_v38  ;;  %v2443_v28 = vcombine.low %v1105_v9, %v1113_v2  ;;  %v1257_v53 = vrot.slane %v4476_v34, %v4033_v49  ;;  %v389_v30 = vmul.f32 0.015625, %v317_v56 }
 0x122   :  { %v2410_v31 = vcombine.low %v2402_v12, %v2409_v25  ;;  %v2450_v35 = vrot.slane %v2442_v26, %v4048_v58  ;;  %v2658_v23 = vcombine.low %v1245_v5, %v1253_v18  ;;  %v388_v10 = vmul.f32 0.015625, %v314_v60  ;;  %v320_v26 = vpop.xlane.xlu0 %319 }
 0x123   :  { %v2457_v13 = vrot.slane %v2443_v28, %v4048_v58  ;;  %v2659_v7 = vcombine.low %v1249_v62, %v1257_v53  ;;  %v1229_v37 = vrot.slane %v4476_v34, %v4036_v50  ;;  %v1233_v27 = vrot.slane %v4476_v34, %v4039_v51 }
 0x124   :  { %v2417_v40 = vrot.slane %v2410_v31, %v4048_v58  ;;  %v2666_v43 = vrot.slane %v2658_v23, %v4048_v58  ;;  %v4569_v29 = vpack.c.bf16 %v389_v30, %v388_v10  ;;  %v1237_v57 = vrot.slane %v4476_v34, %v4042_v54 }
 0x125   :  { %3191 = vperm.xlu1 %3821, %v3054_v20   ;;  %v2458_v59 = vcombine.low %v2450_v35, %v2457_v13  ;;  %v2673_v63 = vrot.slane %v2659_v7, %v4048_v58  ;;  %v1241_v22 = vrot.slane %v4476_v34, %v4045_v55  ;;  %v1277_v44 = vrot.slane %v4498_v11, %v4024_v42 }
 0x126   :  { %v3056_v52 = vunpack.c.l.b16 %v2417_v40  ;;  %v2634_v24 = vcombine.low %v1229_v37, %v1237_v57  ;;  %v1281_v56 = vrot.slane %v4498_v11, %v4027_v47  ;;  %v1285_v1 = vrot.slane %v4498_v11, %v4030_v48 }
 0x127   :  { %v2465_v45 = vrot.slane %v2458_v59, %v4048_v58  ;;  %v2674_v39 = vcombine.low %v2666_v43, %v2673_v63  ;;  %v2635_v61 = vcombine.low %v1233_v27, %v1241_v22  ;;  %v1289_v4 = vrot.slane %v4498_v11, %v4033_v49  ;;  %v4585_v6 = vpop.permute.xlu1 %3086 }
 0x128   :  { %v2642_v34 = vrot.slane %v2634_v24, %v4048_v58  ;;  %v2706_v8 = vcombine.low %v1277_v44, %v1285_v1  ;;  %v1261_v9 = vrot.slane %v4498_v11, %v4036_v50  ;;  %v1265_v21 = vrot.slane %v4498_v11, %v4039_v51 }
 0x129   :  { %3197 = vperm.xlu1 %3821, %v3056_v52   ;;  %v3058_v12 = vunpack.c.l.b16 %v2465_v45  ;;  %v2681_v46 = vrot.slane %v2674_v39, %v4048_v58  ;;  %v2649_v17 = vrot.slane %v2635_v61, %v4048_v58  ;;  %v2707_v38 = vcombine.low %v1281_v56, %v1289_v4 }
 0x12a   :  { %v2714_v2 = vrot.slane %v2706_v8, %v4048_v58  ;;  %v1269_v5 = vrot.slane %v4498_v11, %v4042_v54  ;;  %v1273_v60 = vrot.slane %v4498_v11, %v4045_v55  ;;  %v1309_v25 = vrot.slane %v4514_v32, %v4024_v42 }
 0x12b   :  { %v3067_v62 = vunpack.c.l.b16 %v2681_v46  ;;  %v2650_v18 = vcombine.low %v2642_v34, %v2649_v17  ;;  %v2721_v20 = vrot.slane %v2707_v38, %v4048_v58  ;;  %v1313_v28 = vrot.slane %v4514_v32, %v4027_v47  ;;  %v4608_v11 = vpop.permute.xlu1 %3089 }
 0x12c   :  { %v2682_v53 = vcombine.low %v1261_v9, %v1269_v5  ;;  %v2683_v30 = vcombine.low %v1265_v21, %v1273_v60  ;;  %v1317_v31 = vrot.slane %v4514_v32, %v4030_v48  ;;  %v1321_v35 = vrot.slane %v4514_v32, %v4033_v49 }
 0x12d   :  { %3203 = vperm.xlu1 %3821, %v3058_v12   ;;  %3230 = vperm.xlu0 %3820, %v3067_v62   ;;  %v2657_v23 = vrot.slane %v2650_v18, %v4048_v58  ;;  %v2722_v10 = vcombine.low %v2714_v2, %v2721_v20  ;;  %v391_v13 = vmul.f32 0.015625, %v4550_v14  ;;  %v390_v7 = vmul.f32 0.015625, %v320_v26 }
 0x12e   :  { %v2690_v37 = vrot.slane %v2682_v53, %v4048_v58  ;;  %v2697_v27 = vrot.slane %v2683_v30, %v4048_v58  ;;  %v2754_v40 = vcombine.low %v1309_v25, %v1317_v31  ;;  %v2755_v43 = vcombine.low %v1313_v28, %v1321_v35  ;;  %v326_v30 = vpop.xlane.xlu0 %325 }
 0x12f   :  { %v3066_v57 = vunpack.c.l.b16 %v2657_v23  ;;  %v2729_v59 = vrot.slane %v2722_v10, %v4048_v58  ;;  %v4615_v63 = vpack.c.bf16 %v391_v13, %v390_v7  ;;  %v1293_v22 = vrot.slane %v4514_v32, %v4036_v50  ;;  %v4634_v9 = vpop.permute.xlu1 %3092 }
 0x130   :  { %v2698_v44 = vcombine.low %v2690_v37, %v2697_v27  ;;  %v2762_v52 = vrot.slane %v2754_v40, %v4048_v58  ;;  %v2769_v14 = vrot.slane %v2755_v43, %v4048_v58  ;;  %v1297_v24 = vrot.slane %v4514_v32, %v4039_v51 }
 0x131   :  { %3227 = vperm.xlu1 %3821, %v3066_v57   ;;  %v3069_v56 = vunpack.c.l.b16 %v2729_v59  ;;  %v1301_v1 = vrot.slane %v4514_v32, %v4042_v54  ;;  %v1305_v45 = vrot.slane %v4514_v32, %v4045_v55  ;;  %v1341_v39 = vrot.slane %v4531_v0, %v4024_v42 }
 0x132   :  { %v2705_v61 = vrot.slane %v2698_v44, %v4048_v58  ;;  %v2770_v4 = vcombine.low %v2762_v52, %v2769_v14  ;;  %v1345_v34 = vrot.slane %v4531_v0, %v4027_v47  ;;  %v1349_v8 = vrot.slane %v4531_v0, %v4030_v48 }
 0x133   :  { %3236 = vperm.xlu0 %3820, %v3069_v56   ;;  %v2730_v21 = vcombine.low %v1293_v22, %v1301_v1  ;;  %v2731_v12 = vcombine.low %v1297_v24, %v1305_v45  ;;  %v1353_v32 = vrot.slane %v4531_v0, %v4033_v49  ;;  %v1325_v46 = vrot.slane %v4531_v0, %v4036_v50  ;;  %v4660_v27 = vpop.permute.xlu1 %3095 }
 0x134   :  { %v3068_v17 = vunpack.c.l.b16 %v2705_v61  ;;  %v2777_v38 = vrot.slane %v2770_v4, %v4048_v58  ;;  %v2802_v2 = vcombine.low %v1341_v39, %v1349_v8  ;;  %v1329_v5 = vrot.slane %v4531_v0, %v4039_v51 }
 0x135   :  { %v2738_v60 = vrot.slane %v2730_v21, %v4048_v58  ;;  %v2745_v25 = vrot.slane %v2731_v12, %v4048_v58  ;;  %v2803_v26 = vcombine.low %v1345_v34, %v1353_v32  ;;  %v1333_v62 = vrot.slane %v4531_v0, %v4042_v54 }
 0x136   :  { %3233 = vperm.xlu1 %3821, %v3068_v17   ;;  %v3071_v18 = vunpack.c.l.b16 %v2777_v38  ;;  %v2810_v20 = vrot.slane %v2802_v2, %v4048_v58  ;;  %v1337_v28 = vrot.slane %v4531_v0, %v4045_v55  ;;  %v1373_v53 = vrot.slane %v4541_v16, %v4024_v42 }
 0x137   :  { %v2746_v31 = vcombine.low %v2738_v60, %v2745_v25  ;;  %v2817_v35 = vrot.slane %v2803_v26, %v4048_v58  ;;  %v2778_v23 = vcombine.low %v1325_v46, %v1333_v62  ;;  %v1377_v10 = vrot.slane %v4541_v16, %v4027_v47 }
 0x138   :  { %3242 = vperm.xlu0 %3820, %v3071_v18   ;;  %v2779_v13 = vcombine.low %v1329_v5, %v1337_v28  ;;  %v1381_v7 = vrot.slane %v4541_v16, %v4030_v48  ;;  %v1385_v37 = vrot.slane %v4541_v16, %v4033_v49  ;;  %v393_v0 = vmul.f32 0.015625, %v4565_v41 }
 0x139   :  { %v2753_v40 = vrot.slane %v2746_v31, %v4048_v58  ;;  %v2818_v43 = vcombine.low %v2810_v20, %v2817_v35  ;;  %v2786_v57 = vrot.slane %v2778_v23, %v4048_v58  ;;  %v392_v59 = vmul.f32 0.015625, %v326_v30  ;;  %v4685_v2 = vpop.permute.xlu1 %3098 }
 0x13a   :  { %v2793_v22 = vrot.slane %v2779_v13, %v4048_v58  ;;  %v2850_v44 = vcombine.low %v1373_v53, %v1381_v7  ;;  %v2851_v52 = vcombine.low %v1377_v10, %v1385_v37  ;;  %v1357_v14 = vrot.slane %v4541_v16, %v4036_v50 }
 0x13b   :  { %v3070_v24 = vunpack.c.l.b16 %v2753_v40  ;;  %v2825_v56 = vrot.slane %v2818_v43, %v4048_v58  ;;  %v4668_v1 = vpack.c.bf16 %v393_v0, %v392_v59  ;;  %v1361_v41 = vrot.slane %v4541_v16, %v4039_v51 }
 0x13c   :  { %v2794_v45 = vcombine.low %v2786_v57, %v2793_v22  ;;  %v2858_v39 = vrot.slane %v2850_v44, %v4048_v58  ;;  %v2865_v61 = vrot.slane %v2851_v52, %v4048_v58  ;;  %v1365_v4 = vrot.slane %v4541_v16, %v4042_v54  ;;  %v4714_v44 = vpop.permute.xlu0 %3083 }
 0x13d   :  { %3239 = vperm.xlu1 %3821, %v3070_v24   ;;  %v3073_v34 = vunpack.c.l.b16 %v2825_v56  ;;  %v1369_v8 = vrot.slane %v4541_v16, %v4045_v55  ;;  %v1389_v21 = vrot.slane %v4569_v29, %v4036_v50  ;;  %v1393_v12 = vrot.slane %v4569_v29, %v4039_v51 }
 0x13e   :  { %v2801_v32 = vrot.slane %v2794_v45, %v4048_v58  ;;  %v2866_v46 = vcombine.low %v2858_v39, %v2865_v61  ;;  %v2826_v17 = vcombine.low %v1357_v14, %v1365_v4  ;;  %v1397_v38 = vrot.slane %v4569_v29, %v4042_v54 }
 0x13f   :  { %3248 = vperm.xlu0 %3820, %v3073_v34   ;;  %v2827_v5 = vcombine.low %v1361_v41, %v1369_v8  ;;  %v1401_v16 = vrot.slane %v4569_v29, %v4045_v55  ;;  %v1133_v60 = vrot.slane %v4399_v3, %v4036_v50  ;;  %v1137_v25 = vrot.slane %v4399_v3, %v4039_v51 }
 0x140   :  { %v3072_v26 = vunpack.c.l.b16 %v2801_v32  ;;  %v2873_v62 = vrot.slane %v2866_v46, %v4048_v58  ;;  %v2834_v18 = vrot.slane %v2826_v17, %v4048_v58  ;;  %v2874_v20 = vcombine.low %v1389_v21, %v1397_v38  ;;  %v4716_v52 = vpop.permute.xlu1 %3101  ;;  %v4730_v38 = vpop.permute.xlu0 %3110 }
 0x141   :  { %v2841_v28 = vrot.slane %v2827_v5, %v4048_v58  ;;  %v2875_v53 = vcombine.low %v1393_v12, %v1401_v16  ;;  %v1141_v30 = vrot.slane %v4399_v3, %v4042_v54  ;;  %v1145_v31 = vrot.slane %v4399_v3, %v4045_v55 }
 0x142   :  { %3245 = vperm.xlu1 %3821, %v3072_v26   ;;  %v3075_v35 = vunpack.c.l.b16 %v2873_v62  ;;  %v2882_v23 = vrot.slane %v2874_v20, %v4048_v58  ;;  %v1405_v10 = vrot.slane %v4569_v29, %v4024_v42  ;;  %v1409_v13 = vrot.slane %v4569_v29, %v4027_v47 }
 0x143   :  { %v2842_v7 = vcombine.low %v2834_v18, %v2841_v28  ;;  %v2889_v37 = vrot.slane %v2875_v53, %v4048_v58  ;;  %v2490_v0 = vcombine.low %v1133_v60, %v1141_v30  ;;  %v2491_v40 = vcombine.low %v1137_v25, %v1145_v31 }
 0x144   :  { %3254 = vperm.xlu0 %3820, %v3075_v35   ;;  %v1413_v43 = vrot.slane %v4569_v29, %v4030_v48  ;;  %v1417_v57 = vrot.slane %v4569_v29, %v4033_v49  ;;  %v1149_v59 = vrot.slane %v4399_v3, %v4024_v42  ;;  %v1153_v22 = vrot.slane %v4399_v3, %v4027_v47 }
 0x145   :  { %v2849_v14 = vrot.slane %v2842_v7, %v4048_v58  ;;  %v2890_v24 = vcombine.low %v2882_v23, %v2889_v37  ;;  %v2498_v56 = vrot.slane %v2490_v0, %v4048_v58  ;;  %v2505_v41 = vrot.slane %v2491_v40, %v4048_v58 }
 0x146   :  { %v2898_v45 = vcombine.low %v1405_v10, %v1413_v43  ;;  %v2899_v39 = vcombine.low %v1409_v13, %v1417_v57  ;;  %v1157_v29 = vrot.slane %v4399_v3, %v4030_v48  ;;  %v1161_v61 = vrot.slane %v4399_v3, %v4033_v49 }
 0x147   :  { %v3074_v4 = vunpack.c.l.b16 %v2849_v14  ;;  %v2897_v34 = vrot.slane %v2890_v24, %v4048_v58  ;;  %v2506_v8 = vcombine.low %v2498_v56, %v2505_v41  ;;  %v1421_v21 = vrot.slane %v4615_v63, %v4036_v50  ;;  %v4741_v20 = vpop.permute.xlu1 %3104  ;;  %v4759_v14 = vpop.permute.xlu0 %3116 }
 0x148   :  { %v2906_v12 = vrot.slane %v2898_v45, %v4048_v58  ;;  %v2913_v32 = vrot.slane %v2899_v39, %v4048_v58  ;;  %v2514_v46 = vcombine.low %v1149_v59, %v1157_v29  ;;  %v2515_v17 = vcombine.low %v1153_v22, %v1161_v61 }
 0x149   :  { %3251 = vperm.xlu1 %3821, %v3074_v4   ;;  %v3076_v5 = vunpack.c.l.b16 %v2897_v34  ;;  %v2513_v16 = vrot.slane %v2506_v8, %v4048_v58  ;;  %v1425_v3 = vrot.slane %v4615_v63, %v4039_v51  ;;  %v1429_v60 = vrot.slane %v4615_v63, %v4042_v54 }
 0x14a   :  { %v2914_v25 = vcombine.low %v2906_v12, %v2913_v32  ;;  %v2522_v26 = vrot.slane %v2514_v46, %v4048_v58  ;;  %v2529_v62 = vrot.slane %v2515_v17, %v4048_v58  ;;  %v1433_v18 = vrot.slane %v4615_v63, %v4045_v55 }
 0x14b   :  { %3257 = vperm.xlu0 %3820, %v3076_v5   ;;  %v3060_v28 = vunpack.c.l.b16 %v2513_v16  ;;  %v2922_v53 = vcombine.low %v1421_v21, %v1429_v60  ;;  %v1165_v30 = vrot.slane %v4423_v19, %v4036_v50  ;;  %v1169_v31 = vrot.slane %v4423_v19, %v4039_v51 }
 0x14c   :  { %v2921_v35 = vrot.slane %v2914_v25, %v4048_v58  ;;  %v2530_v23 = vcombine.low %v2522_v26, %v2529_v62  ;;  %v2923_v10 = vcombine.low %v1425_v3, %v1433_v18  ;;  %v1173_v13 = vrot.slane %v4423_v19, %v4042_v54  ;;  %v4793_v18 = vpop.permute.xlu0 %3122 }
 0x14d   :  { %3209 = vperm.xlu1 %3821, %v3060_v28   ;;  %v2930_v7 = vrot.slane %v2922_v53, %v4048_v58  ;;  %v1177_v37 = vrot.slane %v4423_v19, %v4045_v55  ;;  %v1437_v0 = vrot.slane %v4615_v63, %v4024_v42  ;;  %v1441_v40 = vrot.slane %v4615_v63, %v4027_v47  ;;  %v4769_v4 = vpop.permute.xlu1 %3107 }
 0x14e   :  { %v3077_v43 = vunpack.c.l.b16 %v2921_v35  ;;  %v2537_v57 = vrot.slane %v2530_v23, %v4048_v58  ;;  %v2937_v59 = vrot.slane %v2923_v10, %v4048_v58  ;;  %v2538_v22 = vcombine.low %v1165_v30, %v1173_v13 }
 0x14f   :  { %v2539_v24 = vcombine.low %v1169_v31, %v1177_v37  ;;  %v1445_v56 = vrot.slane %v4615_v63, %v4030_v48  ;;  %v1449_v41 = vrot.slane %v4615_v63, %v4033_v49  ;;  %v4766_v45 = vand.u32 127, %v458_v33 }
 0x150   :  { %3260 = vperm.xlu0 %3820, %v3077_v43   ;;  %v3061_v39 = vunpack.c.l.b16 %v2537_v57  ;;  %v2938_v29 = vcombine.low %v2930_v7, %v2937_v59  ;;  %v2546_v61 = vrot.slane %v2538_v22, %v4048_v58  ;;  %v1181_v32 = vrot.slane %v4423_v19, %v4024_v42 }
 0x151   :  { %v2553_v34 = vrot.slane %v2539_v24, %v4048_v58  ;;  %v2946_v8 = vcombine.low %v1437_v0, %v1445_v56  ;;  %v2947_v21 = vcombine.low %v1441_v40, %v1449_v41  ;;  %v3280_v12 = vadd.s32 4294967288, %v4766_v45 }
 0x152   :  { %3212 = vperm.xlu1 %3821, %v3061_v39   ;;  %v2945_v63 = vrot.slane %v2938_v29, %v4048_v58  ;;  %v4776_v33 = vsub.s32 %v4766_v45, %v4021_v36  ;;  %v1185_v46 = vrot.slane %v4423_v19, %v4027_v47  ;;  %v1189_v26 = vrot.slane %v4423_v19, %v4030_v48 }
 0x153   :  { %v2554_v17 = vcombine.low %v2546_v61, %v2553_v34  ;;  %v2954_v5 = vrot.slane %v2946_v8, %v4048_v58  ;;  %v2961_v16 = vrot.slane %v2947_v21, %v4048_v58  ;;  %v4785_v3 = vsub.s32 %v3280_v12, %v4021_v36  ;;  %v4821_v61 = vpop.permute.xlu0 %3128 }
 0x154   :  { %v3078_v60 = vunpack.c.l.b16 %v2945_v63  ;;  %v3279_v25 = vrot.slane %v4714_v44, %v4776_v33  ;;  %v1193_v62 = vrot.slane %v4423_v19, %v4033_v49  ;;  %v1453_v31 = vrot.slane %v4668_v1, %v4036_v50  ;;  %v4804_v10 = vpop.permute.xlu1 %3113 }
 0x155   :  { %v2561_v28 = vrot.slane %v2554_v17, %v4048_v58  ;;  %v2962_v53 = vcombine.low %v2954_v5, %v2961_v16  ;;  %v3284_v30 = vrot.slane %v4585_v6, %v4785_v3  ;;  %v2562_v35 = vcombine.low %v1181_v32, %v1189_v26 }
 0x156   :  { %3263 = vperm.xlu0 %3820, %v3078_v60   ;;  %v2563_v44 = vcombine.low %v1185_v46, %v1193_v62  ;;  %v1457_v23 = vrot.slane %v4668_v1, %v4039_v51  ;;  %v1461_v19 = vrot.slane %v4668_v1, %v4042_v54  ;;  %v1465_v6 = vrot.slane %v4668_v1, %v4045_v55 }
 0x157   :  { %v3062_v13 = vunpack.c.l.b16 %v2561_v28  ;;  %v2969_v7 = vrot.slane %v2962_v53, %v4048_v58  ;;  %v3286_v37 = vsel %vm3285_vm1, %v3284_v30, %v3279_v25  ;;  %v2570_v0 = vrot.slane %v2562_v35, %v4048_v58  ;;  %v4852_v35 = vpop.permute.xlu0 %3134 }
 0x158   :  { %v2577_v40 = vrot.slane %v2563_v44, %v4048_v58  ;;  %v2970_v43 = vcombine.low %v1453_v31, %v1461_v19  ;;  %v3287_v57 = vadd.s32 4294967280, %v4766_v45  ;;  %v2971_v22 = vcombine.low %v1457_v23, %v1465_v6 }
 0x159   :  { %3215 = vperm.xlu1 %3821, %v3062_v13   ;;  %v3079_v59 = vunpack.c.l.b16 %v2969_v7  ;;  %v1197_v24 = vrot.slane %v4448_v15, %v4036_v50  ;;  %v1201_v29 = vrot.slane %v4448_v15, %v4039_v51  ;;  %v1205_v8 = vrot.slane %v4448_v15, %v4042_v54 }
 0x15a   :  { %v2578_v56 = vcombine.low %v2570_v0, %v2577_v40  ;;  %v2978_v41 = vrot.slane %v2970_v43, %v4048_v58  ;;  %v4817_v39 = vsub.s32 %v3287_v57, %v4021_v36  ;;  %v2985_v34 = vrot.slane %v2971_v22, %v4048_v58 }
 0x15b   :  { %3266 = vperm.xlu0 %3820, %v3079_v59   ;;  %v1209_v50 = vrot.slane %v4448_v15, %v4045_v55  ;;  %v1469_v21 = vrot.slane %v4668_v1, %v4024_v42  ;;  %v1473_v51 = vrot.slane %v4668_v1, %v4027_v47  ;;  %v1477_v32 = vrot.slane %v4668_v1, %v4030_v48  ;;  %v4837_v46 = vpop.permute.xlu1 %3119 }
 0x15c   :  { %v2585_v12 = vrot.slane %v2578_v56, %v4048_v58  ;;  %v3291_v63 = vrot.slane %v4608_v11, %v4817_v39  ;;  %v2986_v54 = vcombine.low %v2978_v41, %v2985_v34  ;;  %v2586_v17 = vcombine.low %v1197_v24, %v1205_v8 }
 0x15d   :  { %v2587_v5 = vcombine.low %v1201_v29, %v1209_v50  ;;  %v1481_v55 = vrot.slane %v4668_v1, %v4033_v49  ;;  %v2994_v25 = vcombine.low %v1469_v21, %v1477_v32  ;;  %v3294_v11 = vadd.s32 4294967272, %v4766_v45  ;;  %v4878_v29 = vpop.permute.xlu0 %3140 }
 0x15e   :  { %v3063_v16 = vunpack.c.l.b16 %v2585_v12  ;;  %v3293_v60 = vsel %vm3292_vm2, %v3291_v63, %v3286_v37  ;;  %v2993_v26 = vrot.slane %v2986_v54, %v4048_v58  ;;  %v2594_v62 = vrot.slane %v2586_v17, %v4048_v58 }
 0x15f   :  { %v2601_v28 = vrot.slane %v2587_v5, %v4048_v58  ;;  %v2995_v53 = vcombine.low %v1473_v51, %v1481_v55  ;;  %v3002_v30 = vrot.slane %v2994_v25, %v4048_v58  ;;  %v4848_v31 = vsub.s32 %v3294_v11, %v4021_v36 }
 0x160   :  { %3218 = vperm.xlu1 %3821, %v3063_v16   ;;  %v1213_v1 = vrot.slane %v4448_v15, %v4024_v42  ;;  %v3080_v44 = vunpack.c.l.b16 %v2993_v26  ;;  %v1217_v13 = vrot.slane %v4448_v15, %v4027_v47  ;;  %v1221_v37 = vrot.slane %v4448_v15, %v4030_v48 }
 0x161   :  { %v2602_v23 = vcombine.low %v2594_v62, %v2601_v28  ;;  %v3009_v19 = vrot.slane %v2995_v53, %v4048_v58  ;;  %v3298_v7 = vrot.slane %v4634_v9, %v4848_v31  ;;  %v1225_v6 = vrot.slane %v4448_v15, %v4033_v49  ;;  %v4864_v0 = vpop.permute.xlu1 %3125  ;;  %v3147_v26 = vpop.permute.xlu0 %3146 }
 0x162   :  { %v3301_v42 = vadd.s32 4294967264, %v4766_v45  ;;  %3269 = vperm.xlu0 %3820, %v3080_v44   ;;  %v2610_v47 = vcombine.low %v1213_v1, %v1221_v37  ;;  %v3308_v49 = vadd.s32 4294967256, %v4766_v45  ;;  %v3336_v41 = vadd.s32 4294967224, %v4766_v45 }
 0x163   :  { %v2609_v40 = vrot.slane %v2602_v23, %v4048_v58  ;;  %v3010_v43 = vcombine.low %v3002_v30, %v3009_v19  ;;  %v3300_v57 = vsel %vm3299_vm3, %v3298_v7, %v3293_v60  ;;  %v2611_v59 = vcombine.low %v1217_v13, %v1225_v6 }
 0x164   :  { %v4869_v9 = vsub.s32 %v3301_v42, %v4021_v36  ;;  %v2618_v15 = vrot.slane %v2610_v47, %v4048_v58  ;;  %v4881_v8 = vsub.s32 %v3308_v49, %v4021_v36  ;;  %v3350_v50 = vadd.s32 4294967208, %v4766_v45 }
 0x165   :  { %v3064_v22 = vunpack.c.l.b16 %v2609_v40  ;;  %v3017_v48 = vrot.slane %v3010_v43, %v4048_v58  ;;  %v2625_v24 = vrot.slane %v2611_v59, %v4048_v58  ;;  %v3315_v63 = vadd.s32 4294967248, %v4766_v45  ;;  %v3153_v43 = vpop.permute.xlu0 %3152 }
 0x166   :  { %v3305_v56 = vrot.slane %v4660_v27, %v4869_v9  ;;  %v3312_v27 = vrot.slane %v4685_v2, %v4881_v8  ;;  %v3364_v32 = vadd.s32 4294967192, %v4766_v45  ;;  %v3322_v54 = vadd.s32 4294967240, %v4766_v45 }
 0x167   :  { %3221 = vperm.xlu1 %3821, %v3064_v22   ;;  %v3081_v34 = vunpack.c.l.b16 %v3017_v48  ;;  %v2626_v21 = vcombine.low %v2618_v15, %v2625_v24  ;;  %v3132_v51 = vpop.permute.xlu1 %3131  ;;  %v4892_v5 = vsub.s32 %v3336_v41, %v4021_v36  ;;  %v4895_v55 = vsub.s32 %v3315_v63, %v4021_v36 }
 0x168   :  { %v3307_v12 = vsel %vm3306_vm4, %v3305_v56, %v3300_v57  ;;  %v4899_v60 = vsub.s32 %v3350_v50, %v4021_v36  ;;  %v4902_v2 = vsub.s32 %v3322_v54, %v4021_v36  ;;  %v4908_v62 = vsub.s32 %v3364_v32, %v4021_v36 }
 0x169   :  { %3272 = vperm.xlu0 %3820, %v3081_v34   ;;  %v2633_v17 = vrot.slane %v2626_v21, %v4048_v58  ;;  %v3314_v16 = vsel %vm3313_vm5, %v3312_v27, %v3307_v12  ;;  %v3319_v11 = vrot.slane %v4716_v52, %v4895_v55  ;;  %v3329_v58 = vadd.s32 4294967232, %v4766_v45  ;;  %v3159_v21 = vpop.permute.xlu0 %3158 }
 0x16a   :  { %v3326_v28 = vrot.slane %v4741_v20, %v4902_v2  ;;  %v3378_v53 = vadd.s32 4294967176, %v4766_v45  ;;  %v3340_v52 = vrot.slane %v4730_v38, %v4892_v5  ;;  %v3343_v19 = vadd.s32 4294967216, %v4766_v45 }
 0x16b   :  { %v3065_v25 = vunpack.c.l.b16 %v2633_v17  ;;  %v3321_v30 = vsel %vm3320_vm6, %v3319_v11, %v3314_v16  ;;  %v4915_v1 = vsub.s32 %v3329_v58, %v4021_v36  ;;  %v3354_v20 = vrot.slane %v4759_v14, %v4899_v60 }
 0x16c   :  { %v3328_v23 = vsel %vm3327_vm7, %v3326_v28, %v3321_v30  ;;  %v3357_v7 = vadd.s32 4294967200, %v4766_v45  ;;  %v3368_v37 = vrot.slane %v4793_v18, %v4908_v62  ;;  %v4929_v6 = vsub.s32 %v3378_v53, %v4021_v36 }
 0x16d   :  { %3224 = vperm.xlu1 %3821, %v3065_v25   ;;  %v3333_v13 = vrot.slane %v4769_v4, %v4915_v1  ;;  %v4932_v38 = vsub.s32 %v3343_v19, %v4021_v36  ;;  %v3371_v42 = vadd.s32 4294967184, %v4766_v45  ;;  %v3392_v14 = vrot.slane %v4852_v35, %v4785_v3 }
 0x16e   :  { %v3138_v44 = vpop.permute.xlu1 %3137  ;;  %v4939_v4 = vsub.s32 %v3357_v7, %v4021_v36  ;;  %v3388_v35 = vrot.slane %v3132_v51, %v4776_v33  ;;  %v3402_v15 = vrot.slane %v4878_v29, %v4848_v31  ;;  %v3382_v34 = vrot.slane %v4821_v61, %v4929_v6 }
 0x16f   :  { %v3335_v40 = vsel %vm3334_vm8, %v3333_v13, %v3328_v23  ;;  %v3347_v57 = vrot.slane %v4804_v10, %v4932_v38  ;;  %v4945_v47 = vsub.s32 %v3371_v42, %v4021_v36  ;;  %v3397_v59 = vrot.slane %v3138_v44, %v4817_v39  ;;  %v3165_v16 = vpop.permute.xlu0 %3164 }
 0x170   :  { %v3342_v18 = vsel %vm3341_vm9, %v3340_v52, %v3335_v40  ;;  %v3361_v45 = vrot.slane %v4837_v46, %v4939_v4  ;;  %v3393_v46 = vsel %vm3285_vm1, %v3392_v14, %v3388_v35  ;;  %v3422_v61 = vrot.slane %v3153_v43, %v4902_v2 }
 0x171   :  { %v3349_v48 = vsel %vm3348_vm10, %v3347_v57, %v3342_v18  ;;  %v3375_v49 = vrot.slane %v4864_v0, %v4945_v47  ;;  %v3398_v41 = vsel %vm3292_vm2, %v3397_v59, %v3393_v46  ;;  %v3412_v0 = vrot.slane %v3147_v26, %v4881_v8 }
 0x172   :  { %v3356_v24 = vsel %vm3355_vm11, %v3354_v20, %v3349_v48  ;;  %v3403_v29 = vsel %vm3299_vm3, %v3402_v15, %v3398_v41  ;;  %v3432_v26 = vrot.slane %v3159_v21, %v4892_v5  ;;  %v3442_v23 = vrot.slane %v3165_v16, %v4899_v60 }
 0x173   :  { %v3363_v56 = vsel %vm3362_vm12, %v3361_v45, %v3356_v24 }
 0x174   :  { %v3144_v22 = vpop.permute.xlu1 %3143  ;;  %v3370_v50 = vsel %vm3369_vm13, %v3368_v37, %v3363_v56 }
 0x175   :  { %v3407_v10 = vrot.slane %v3144_v22, %v4869_v9  ;;  %v3377_v12 = vsel %vm3376_vm14, %v3375_v49, %v3370_v50  ;;  %v3171_v53 = vpop.permute.xlu0 %3170 }
 0x176   :  { %v4969_v51 = vsel %vm3383_vm15, %v3382_v34, %v3377_v12  ;;  %v3452_v42 = vrot.slane %v3171_v53, %v4908_v62 }
 0x177   :  { %v3408_v63 = vsel %vm3306_vm4, %v3407_v10, %v3403_v29 }
 0x178   :  { %v3413_v32 = vsel %vm3313_vm5, %v3412_v0, %v3408_v63 }
 0x17a   :  { %v3150_v27 = vpop.permute.xlu1 %3149 }
 0x17b   :  { %v3417_v54 = vrot.slane %v3150_v27, %v4895_v55  ;;  %v3177_v19 = vpop.permute.xlu0 %3176 }
 0x17c   :  { %v3462_v45 = vrot.slane %v3177_v19, %v4929_v6 }
 0x17d   :  { %v3418_v17 = vsel %vm3320_vm6, %v3417_v54, %v3413_v32 }
 0x17e   :  { %v3423_v25 = vsel %vm3327_vm7, %v3422_v61, %v3418_v17 }
 0x180   :  { %v3156_v11 = vpop.permute.xlu1 %3155 }
 0x181   :  { %v3427_v58 = vrot.slane %v3156_v11, %v4915_v1 }
 0x182   :  { %v3183_v40 = vpop.permute.xlu0 %3182 }
 0x183   :  { %v3428_v28 = vsel %vm3334_vm8, %v3427_v58, %v3423_v25 }
 0x184   :  { %v3433_v30 = vsel %vm3341_vm9, %v3432_v26, %v3428_v28 }
 0x187   :  { %v3162_v44 = vpop.permute.xlu1 %3161 }
 0x188   :  { %v3437_v52 = vrot.slane %v3162_v44, %v4932_v38  ;;  %v3189_v35 = vpop.permute.xlu0 %3188 }
 0x18a   :  { %v3438_v20 = vsel %vm3348_vm10, %v3437_v52, %v3433_v30 }
 0x18b   :  { %v3443_v13 = vsel %vm3355_vm11, %v3442_v23, %v3438_v20  ;;  %v3471_v20 = vrot.slane %v3183_v40, %v4785_v3 }
 0x18d   :  { %v3168_v7 = vpop.permute.xlu1 %3167 }
 0x18e   :  { %v3447_v37 = vrot.slane %v3168_v7, %v4939_v4  ;;  %v3195_v49 = vpop.permute.xlu0 %3194 }
 0x190   :  { %v3448_v14 = vsel %vm3362_vm12, %v3447_v37, %v3443_v13 }
 0x191   :  { %v3453_v43 = vsel %vm3369_vm13, %v3452_v42, %v3448_v14 }
 0x193   :  { %v3174_v18 = vpop.permute.xlu1 %3173 }
 0x194   :  { %v3457_v57 = vrot.slane %v3174_v18, %v4945_v47  ;;  %v3201_v15 = vpop.permute.xlu0 %3200 }
 0x196   :  { %v3458_v59 = vsel %vm3376_vm14, %v3457_v57, %v3453_v43  ;;  %v3481_v57 = vrot.slane %v3189_v35, %v4848_v31 }
 0x197   :  { %v4992_v22 = vsel %vm3383_vm15, %v3462_v45, %v3458_v59 }
 0x199   :  { %v3180_v48 = vpop.permute.xlu1 %3179 }
 0x19a   :  { %v3467_v44 = vrot.slane %v3180_v48, %v4776_v33 }
 0x19b   :  { %v4994_v46 = vpop.permute.xlu0 %3206 }
 0x19c   :  { %v3472_v42 = vsel %vm3285_vm1, %v3471_v20, %v3467_v44 }
 0x1a0   :  { %v3186_v10 = vpop.permute.xlu1 %3185 }
 0x1a1   :  { %v3476_v19 = vrot.slane %v3186_v10, %v4817_v39 }
 0x1a3   :  { %v3477_v43 = vsel %vm3292_vm2, %v3476_v19, %v3472_v42 }
 0x1a4   :  { %v3192_v24 = vpop.permute.xlu1 %3191  ;;  %v3482_v59 = vsel %vm3299_vm3, %v3481_v57, %v3477_v43 }
 0x1a8   :  { %v3198_v56 = vpop.permute.xlu1 %3197 }
 0x1ac   :  { %v3204_v41 = vpop.permute.xlu1 %3203  ;;  %v3231_v34 = vpop.permute.xlu0 %3230 }
 0x1ad   :  { %v3550_v58 = vrot.slane %v3231_v34, %v4785_v3  ;;  %v3496_v34 = vrot.slane %v3198_v56, %v4895_v55 }
 0x1b0   :  { %v3228_v0 = vpop.permute.xlu1 %3227 }
 0x1b1   :  { %v3546_v16 = vrot.slane %v3228_v0, %v4776_v33  ;;  %v3486_v33 = vrot.slane %v3192_v24, %v4869_v9 }
 0x1b2   :  { %v3237_v50 = vpop.permute.xlu0 %3236 }
 0x1b3   :  { %v3551_v26 = vsel %vm3285_vm1, %v3550_v58, %v3546_v16  ;;  %v3560_v52 = vrot.slane %v3237_v50, %v4848_v31  ;;  %v3487_v10 = vsel %vm3306_vm4, %v3486_v33, %v3482_v59 }
 0x1b5   :  { %v3234_v21 = vpop.permute.xlu1 %3233 }
 0x1b6   :  { %v3555_v11 = vrot.slane %v3234_v21, %v4817_v39 }
 0x1b7   :  { %v3243_v29 = vpop.permute.xlu0 %3242 }
 0x1b8   :  { %v3556_v28 = vsel %vm3292_vm2, %v3555_v11, %v3551_v26  ;;  %v3570_v14 = vrot.slane %v3243_v29, %v4881_v8  ;;  %v3848_v11 = vmov 1966171168  }
 0x1b9   :  { %v3561_v13 = vsel %vm3299_vm3, %v3560_v52, %v3556_v28 }
 0x1bc   :  { %v3240_v12 = vpop.permute.xlu1 %3239 }
 0x1bd   :  { %v3565_v53 = vrot.slane %v3240_v12, %v4869_v9  ;;  %v3491_v9 = vrot.slane %v3195_v49, %v4881_v8  ;;  %v3506_v12 = vrot.slane %v3204_v41, %v4915_v1 }
 0x1be   :  { %v3249_v63 = vpop.permute.xlu0 %3248 }
 0x1bf   :  { %v3566_v7 = vsel %vm3306_vm4, %v3565_v53, %v3561_v13  ;;  %v3580_v48 = vrot.slane %v3249_v63, %v4902_v2  ;;  %v3492_v0 = vsel %vm3313_vm5, %v3491_v9, %v3487_v10  ;;  %v3501_v63 = vrot.slane %v3201_v15, %v4902_v2 }
 0x1c0   :  { %v3571_v39 = vsel %vm3313_vm5, %v3570_v14, %v3566_v7  ;;  %v3497_v29 = vsel %vm3320_vm6, %v3496_v34, %v3492_v0  ;;  %v3511_v2 = vrot.slane %v4994_v46, %v4892_v5 }
 0x1c1   :  { %v3246_v27 = vpop.permute.xlu1 %3245  ;;  %v3502_v49 = vsel %vm3327_vm7, %v3501_v63, %v3497_v29 }
 0x1c2   :  { %v3575_v37 = vrot.slane %v3246_v27, %v4895_v55  ;;  %v3507_v27 = vsel %vm3334_vm8, %v3506_v12, %v3502_v49 }
 0x1c3   :  { %v3255_v32 = vpop.permute.xlu0 %3254  ;;  %v3512_v28 = vsel %vm3341_vm9, %v3511_v2, %v3507_v27 }
 0x1c4   :  { %v3576_v40 = vsel %vm3320_vm6, %v3575_v37, %v3571_v39  ;;  %v3590_v50 = vrot.slane %v3255_v32, %v4892_v5 }
 0x1c5   :  { %v3581_v24 = vsel %vm3327_vm7, %v3580_v48, %v3576_v40 }
 0x1c8   :  { %v3252_v54 = vpop.permute.xlu1 %3251 }
 0x1c9   :  { %v3585_v45 = vrot.slane %v3252_v54, %v4915_v1 }
 0x1ca   :  { %v3258_v61 = vpop.permute.xlu0 %3257 }
 0x1cb   :  { %v3586_v31 = vsel %vm3334_vm8, %v3585_v45, %v3581_v24  ;;  %v3595_v8 = vrot.slane %v3258_v61, %v4932_v38 }
 0x1cc   :  { %v4996_v17 = vpop.permute.xlu1 %3209  ;;  %v3591_v55 = vsel %vm3341_vm9, %v3590_v50, %v3586_v31 }
 0x1cd   :  { %v3596_v54 = vsel %vm3348_vm10, %v3595_v8, %v3591_v55  ;;  %v3516_v32 = vrot.slane %v4996_v17, %v4932_v38 }
 0x1cf   :  { %v3261_v25 = vpop.permute.xlu0 %3260  ;;  %v3517_v5 = vsel %vm3348_vm10, %v3516_v32, %v3512_v28 }
 0x1d0   :  { %v3600_v56 = vrot.slane %v3261_v25, %v4899_v60  ;;  %v3627_v25 = vunpack.c.l.s4 %v3848_v11 }
 0x1d1   :  { %v3213_v30 = vpop.permute.xlu1 %3212 }
 0x1d2   :  { %v3521_v15 = vrot.slane %v3213_v30, %v4899_v60  ;;  %v3601_v38 = vsel %vm3355_vm11, %v3600_v56, %v3596_v54  ;;  %v3628_v44 = vunpack.c.0.s8 %v3627_v25 }
 0x1d4   :  { %v3522_v30 = vsel %vm3355_vm11, %v3521_v15, %v3517_v5  ;;  %v3631_v37 = vsub.s32 %v3628_v44, %v4021_v36 }
 0x1d5   :  { %v3264_v23 = vpop.permute.xlu0 %3263 }
 0x1d6   :  { %v3605_v16 = vrot.slane %v3264_v23, %v4939_v4 }
 0x1d8   :  { %v3216_v18 = vpop.permute.xlu1 %3215  ;;  %v3606_v60 = vsel %vm3362_vm12, %v3605_v16, %v3601_v38 }
 0x1d9   :  { %v3526_v58 = vrot.slane %v3216_v18, %v4939_v4 }
 0x1da   :  { %v3267_v3 = vpop.permute.xlu0 %3266 }
 0x1db   :  { %v3610_v41 = vrot.slane %v3267_v3, %v4908_v62  ;;  %v3527_v52 = vsel %vm3362_vm12, %v3526_v58, %v3522_v30 }
 0x1dd   :  { %v3611_v4 = vsel %vm3369_vm13, %v3610_v41, %v3606_v60 }
 0x1df   :  { %v3219_v35 = vpop.permute.xlu1 %3218 }
 0x1e0   :  { %v3531_v17 = vrot.slane %v3219_v35, %v4908_v62 }
 0x1e1   :  { %v3270_v21 = vpop.permute.xlu0 %3269 }
 0x1e2   :  { %v3615_v26 = vrot.slane %v3270_v21, %v4945_v47  ;;  %v3532_v62 = vsel %vm3369_vm13, %v3531_v17, %v3527_v52 }
 0x1e4   :  { %v3616_v23 = vsel %vm3376_vm14, %v3615_v26, %v3611_v4 }
 0x1e6   :  { %v3222_v1 = vpop.permute.xlu1 %3221 }
 0x1e7   :  { %v3536_v46 = vrot.slane %v3222_v1, %v4945_v47 }
 0x1e8   :  { %v3273_v61 = vpop.permute.xlu0 %3272 }
 0x1e9   :  { %v3620_v53 = vrot.slane %v3273_v61, %v4929_v6  ;;  %v3537_v7 = vsel %vm3376_vm14, %v3536_v46, %v3532_v62 }
 0x1eb   :  { %v3621_v20 = vsel %vm3383_vm15, %v3620_v53, %v3616_v23 }
 0x1ec   :  { %v3225_v19 = vpop.permute.xlu1 %3224  ;;  %v3624_v14 = vsel %vm3622_vm0, %v3621_v20, %v4992_v22 }
 0x1ed   :  { %v3541_v13 = vrot.slane %v3225_v19, %v4929_v6 }
 0x1ef   :  { %v3542_v47 = vsel %vm3383_vm15, %v3541_v13, %v3537_v7 }
 0x1f0   :  { %v3623_v42 = vsel %vm3622_vm0, %v3542_v47, %v4969_v51 }
 0x1f1   :  { %v3625_v43 = vpack.c.b16 %v3624_v14, %v3623_v42 }
 0x1f3   :  { %v3632_v33 = vrot.slane %v3625_v43, %v3631_v37 }
 0x1f5   :  { %3656 = vst.sshfl [vmem:[#allocation2] sm:$0x5 pattern:$0x73625140] %v3632_v33 }
 0x1f6   :  { %3833 = shalt.err (!%p3830_p4)
}
 0x1f7   :  { %s3834_s16 = scalar_lea.hbm %s5078_s1, 32 }
 0x1f8   :  { %p3835_p5 = scmp.ne.s32.totalorder %s5078_s1, %s3834_s16  ;;  %p3838_p6 = scmp.lt.u32.totalorder %s3834_s16, %s5078_s1 }
 0x1fa   :  { %p3840_p7 = pnand %p3838_p6, %p3835_p5 }
 0x1fc   :  { %3843 = shalt.err (!%p3840_p7)
}
 0x1fd   :  { %3651 = dma.vmem_to_hbm [thread:$0]  %s3649_s12, 32, %s5078_s1, [#allocation3]  }
 0x1fe   :  { %3844 = dma.done.wait [#allocation3], 32  }
 0x1ff   :  { %3845 = vsyncadd [#allocation3], 4294967264 }
 0x200   :  { %3655 = vsyncpa [#allocation3], 1 }

</bundles_post_ra>
